<compile_context>
chip_gen: v7x
topology: tpu7x:2x2x1
jax: 0.10.0
libtpu: 0.0.40
codegen_flags: <defaults>
</compile_context>

<pallas_src>
import functools

import jax
import jax.numpy as jnp
from jax.experimental import pallas as pl
from jax.experimental.pallas import tpu as pltpu


# ----------------------------------------------------------------------------
# Pallas kernel: one fused CompGCN layer
# ----------------------------------------------------------------------------

def _layer_kernel(*refs, d_out, apply_relu, apply_ln, compute_rel, fuse_256,
                  eps=1e-5):
    """Fused CompGCN layer.

    refs (inputs):  st_col [2E,1] i32, r_col [E,1] i32, scale [E,1] f32,
                    x [N,D] f32, rel [R,D] bf16,
                    w_out/w_in/w_loop [D,D] bf16, loop_rel/bias/gamma/beta [1,D] f32,
                    (w_rel [D,D] bf16 — last layer only)
    refs (outputs): x_out [N,D] f32, (rel_out [R,D] f32 — last layer only)
    """
    if compute_rel:
        (st_col_ref, r_col_ref, scale_ref, x_ref, rel_ref,
         w_out_ref, w_in_ref, w_loop_ref, loop_rel_ref,
         bias_ref, gamma_ref, beta_ref, w_rel_ref,
         x_out_ref, rel_out_ref) = refs
    else:
        (st_col_ref, r_col_ref, scale_ref, x_ref, rel_ref,
         w_out_ref, w_in_ref, w_loop_ref, loop_rel_ref,
         bias_ref, gamma_ref, beta_ref,
         x_out_ref) = refs
        w_rel_ref = None
        rel_out_ref = None

    f32 = jnp.float32
    bf16 = jnp.bfloat16

    N, D = x_ref.shape            # padded nodes, padded feature dim
    R = rel_ref.shape[0]          # padded relation rows
    E2 = st_col_ref.shape[0]      # 2 * padded edges   ([src ; dst] indices)
    E = E2 // 2

    x = x_ref[...]                # [N, D] f32
    x_b = x.astype(bf16)
    rel_b = rel_ref[...]          # [R, D] bf16 (pre-cast on host)

    # ---- one-hot structure, built ONCE, directly in bf16 -------------------
    # rows [:E]  -> source gather matrix g_s
    # rows [E:]  -> target gather matrix g_t
    st_col = st_col_ref[...]                                       # [2E, 1]
    lane_n = jax.lax.broadcasted_iota(jnp.int32, (E2, N), 1)
    g_st = jnp.where(lane_n == st_col, 1.0, 0.0).astype(bf16)      # [2E, N]

    r_col = r_col_ref[...]                                         # [E, 1]
    lane_r = jax.lax.broadcasted_iota(jnp.int32, (E, R), 1)
    g_r = jnp.where(lane_r == r_col, 1.0, 0.0).astype(bf16)        # [E, R]

    # per-edge symmetric degree scale (precomputed, layer-invariant, 0 on pads)
    edge_scale = scale_ref[...]                                    # [E, 1] f32

    dn = (((0,), (0,)), ((), ()))   # contract dim 0 of lhs with dim 0 of rhs

    # ---- gathers via one-hot matmuls (bf16 MXU, f32 accumulate) ------------
    if fuse_256:
        # single 2E-row gather: rows [:E] = x[s], rows [E:] = x[t]
        ent_st = jnp.dot(g_st, x_b, preferred_element_type=f32)    # [2E, D]
        ent_s = ent_st[:E]
        ent_t = ent_st[E:]
    else:
        g_s = g_st[:E]
        g_t = g_st[E:]
        ent_s = jnp.dot(g_s, x_b, preferred_element_type=f32)      # [E, D]
        ent_t = jnp.dot(g_t, x_b, preferred_element_type=f32)
    rel_r = jnp.dot(g_r, rel_b, preferred_element_type=f32)        # [E, D]

    # ---- compose ('sub') + per-edge norm, then direction matmuls -----------
    comp_out = (ent_s - rel_r) * edge_scale                        # [E, D]
    comp_in = (ent_t - rel_r) * edge_scale
    msg_out = jnp.dot(comp_out.astype(bf16), w_out_ref[...],
                      preferred_element_type=f32)                  # [E, D]
    msg_in = jnp.dot(comp_in.astype(bf16), w_in_ref[...],
                     preferred_element_type=f32)

    # ---- scatter-add via transposed-LHS contraction -------------------------
    #   g_s^T @ msg_in  (scatter msg_in to src)  +  g_t^T @ msg_out (to dst)
    if fuse_256:
        msg_cat = jnp.concatenate(
            [msg_in.astype(bf16), msg_out.astype(bf16)], axis=0)   # [2E, D]
        agg = jax.lax.dot_general(g_st, msg_cat, dn,
                                  preferred_element_type=f32)      # [N, D]
    else:
        agg = (jax.lax.dot_general(g_s, msg_in.astype(bf16), dn,
                                   preferred_element_type=f32)
               + jax.lax.dot_general(g_t, msg_out.astype(bf16), dn,
                                     preferred_element_type=f32))

    # ---- self-loop -----------------------------------------------------------
    comp_loop = (x - loop_rel_ref[...]).astype(bf16)               # [N, D]
    msg_loop = jnp.dot(comp_loop, w_loop_ref[...],
                       preferred_element_type=f32)

    out = (agg + msg_loop) * (1.0 / 3.0) + bias_ref[...]
    # TODO(synk): dropout omitted (inference mode -> identity)
    if apply_relu:
        out = jnp.maximum(out, 0.0)
    if apply_ln:
        # masked LayerNorm over the first d_out (true) lanes only
        lane = jax.lax.broadcasted_iota(jnp.int32, (N, D), 1)
        mask = (lane < d_out).astype(f32)
        inv_d = 1.0 / d_out
        mean = jnp.sum(out * mask, axis=-1, keepdims=True) * inv_d
        cent = (out - mean) * mask
        var = jnp.sum(cent * cent, axis=-1, keepdims=True) * inv_d
        out = cent * jax.lax.rsqrt(var + eps) * gamma_ref[...] + beta_ref[...]
    x_out_ref[...] = out

    if compute_rel:
        # final relation projection (w_rel), last layer only
        rel_out_ref[...] = jnp.dot(rel_b, w_rel_ref[...],
                                   preferred_element_type=f32)


# ----------------------------------------------------------------------------
# pallas_call wrapper (small problem -> one full-array block per operand)
# ----------------------------------------------------------------------------

# Single-block design: at D = N = E = R = 128 the resident working set
# (bf16 one-hots + bf16 weights + a handful of f32 [E,D]/[N,D] temporaries)
# is ~1-2 MiB, far below every chip's VMEM.  The limit is set explicitly so
# the budget is visible (and fails loudly) if the padding is ever scaled up.
_CPARAMS = pltpu.CompilerParams(
    dimension_semantics=("arbitrary",),
    vmem_limit_bytes=32 * 1024 * 1024,
)


def _round_up(v, m):
    return ((v + m - 1) // m) * m


def _pad2(a, rows, cols):
    out = jnp.zeros((rows, cols), a.dtype)
    return out.at[:a.shape[0], :a.shape[1]].set(a)


def _full_spec(shape):
    nd = len(shape)
    return pl.BlockSpec(shape, lambda i, _nd=nd: (0,) * _nd)


def _mxu_is_256x256():
    """Host-side chip check: fuse to 256-deep/256-row matmuls on v6e/v7x only."""
    try:
        kind = jax.devices()[0].device_kind.lower()
    except Exception:
        return True
    for tag in ("v2", "v3", "v4", "v5"):
        if tag in kind:
            return False
    return True


def compgcn_layer_call(x_pad, lp, st_col, r_col, edge_scale, *, apply_relu,
                       apply_ln, d_out, compute_rel, fuse_256,
                       n_pad, d_pad, r_pad):
    """One fused pallas_call for an entire CompGCN layer."""
    kern = functools.partial(_layer_kernel, d_out=d_out, apply_relu=apply_relu,
                             apply_ln=apply_ln, compute_rel=compute_rel,
                             fuse_256=fuse_256)
    args = [st_col, r_col, edge_scale,
            x_pad, lp["rel_emb"], lp["w_out"], lp["w_in"], lp["w_loop"],
            lp["loop_rel"], lp["bias"], lp["ln_gamma"], lp["ln_beta"]]
    if compute_rel:
        args.append(lp["w_rel"])
        out_shape = (jax.ShapeDtypeStruct((n_pad, d_pad), jnp.float32),
                     jax.ShapeDtypeStruct((r_pad, d_pad), jnp.float32))
        out_specs = (_full_spec((n_pad, d_pad)), _full_spec((r_pad, d_pad)))
    else:
        out_shape = jax.ShapeDtypeStruct((n_pad, d_pad), jnp.float32)
        out_specs = _full_spec((n_pad, d_pad))

    result = pl.pallas_call(
        kern,
        out_shape=out_shape,
        grid=(1,),
        in_specs=[_full_spec(a.shape) for a in args],
        out_specs=out_specs,
        compiler_params=_CPARAMS,
    )(*args)

    if compute_rel:
        return result[0], result[1]
    return result, None


# ----------------------------------------------------------------------------
# Parameter initialization (deterministic, synthetic; matches module init)
# ----------------------------------------------------------------------------

def xavier_uniform(key, shape, gain=1.0):
    fan_in, fan_out = shape[0], shape[1]
    a = gain * jnp.sqrt(6.0 / (fan_in + fan_out))
    return jax.random.uniform(key, shape, jnp.float32, -a, a)


RELU_GAIN = jnp.sqrt(2.0)   # nn.init.calculate_gain('relu')


def init_params(key, in_channels_dict, num_nodes_per_type, mlp_out,
                conv_hidden, num_layers, num_relations):
    params = {"mlp": {}, "layers": []}
    keys = jax.random.split(key, 64)
    ki = 0

    for node_type, in_ch in in_channels_dict.items():
        n = num_nodes_per_type[node_type]
        if in_ch is None:
            params["mlp"][node_type] = {
                "embedding": jax.random.normal(keys[ki], (n, mlp_out),
                                               jnp.float32)}
        else:
            params["mlp"][node_type] = {
                "w": xavier_uniform(keys[ki], (in_ch, mlp_out)),     # [in, out]
                "b": jnp.zeros((1, mlp_out), jnp.float32)}
        ki += 1

    for idx in range(num_layers):
        d_in = conv_hidden[f"layer_{idx - 1}"] if idx > 0 else mlp_out
        d_out = conv_hidden[f"layer_{idx}"]
        layer = {
            "rel_emb": xavier_uniform(keys[ki + 0], (2 * num_relations, d_in)),
            "w_loop": xavier_uniform(keys[ki + 1], (d_in, d_out), RELU_GAIN),
            "w_in":   xavier_uniform(keys[ki + 2], (d_in, d_out), RELU_GAIN),
            "w_out":  xavier_uniform(keys[ki + 3], (d_in, d_out), RELU_GAIN),
            "w_rel":  xavier_uniform(keys[ki + 4], (d_in, d_out), RELU_GAIN),
            "loop_rel": xavier_uniform(keys[ki + 5], (1, d_in), RELU_GAIN),
            "bias": jnp.zeros((1, d_out), jnp.float32),
            "ln_gamma": jnp.ones((1, d_out), jnp.float32),
            "ln_beta": jnp.zeros((1, d_out), jnp.float32),
        }
        ki += 6
        params["layers"].append(layer)
    return params


def _pad_layer_params(layer, d_pad, r_pad):
    bf16 = jnp.bfloat16
    return {
        # big operands pre-cast to bf16 on the host (halves weight DMA bytes)
        "rel_emb": _pad2(layer["rel_emb"], r_pad, d_pad).astype(bf16),
        "w_loop": _pad2(layer["w_loop"], d_pad, d_pad).astype(bf16),
        "w_in":   _pad2(layer["w_in"], d_pad, d_pad).astype(bf16),
        "w_out":  _pad2(layer["w_out"], d_pad, d_pad).astype(bf16),
        "w_rel":  _pad2(layer["w_rel"], d_pad, d_pad).astype(bf16),
        # small row vectors stay f32 (used in f32 math)
        "loop_rel": _pad2(layer["loop_rel"], 1, d_pad),
        "bias": _pad2(layer["bias"], 1, d_pad),
        "ln_gamma": _pad2(layer["ln_gamma"], 1, d_pad),   # pad lanes 0 (masked)
        "ln_beta": _pad2(layer["ln_beta"], 1, d_pad),
    }


# ----------------------------------------------------------------------------
# Model forward
# ----------------------------------------------------------------------------

def hetero_compgcn_forward(params, x_dict, edge_index, node_type_offset,
                           num_nodes_per_type, num_entities, mlp_out,
                           conv_hidden, num_layers, num_relations,
                           use_layer_norm=True, edge_norm=True):
    d_dims = [mlp_out] + [conv_hidden[f"layer_{i}"] for i in range(num_layers)]
    d_pad = _round_up(max(d_dims), 128)          # lane-dense feature dim
    n_pad = _round_up(num_entities, 128)
    num_edges = edge_index.shape[0]
    e_pad = _round_up(num_edges, 128)
    r_pad = _round_up(2 * num_relations, 128)

    # ---- type-specific MLP / embedding -> padded x_all ---------------------
    x_pad = jnp.zeros((n_pad, d_pad), jnp.float32)
    for node_type, feats in x_dict.items():
        off = node_type_offset[node_type]
        n = num_nodes_per_type[node_type]
        p = params["mlp"][node_type]
        if feats is None:
            emb = p["embedding"]                  # arange lookup == full table
        else:
            # tiny per-type projection: plain XLA dot (a dedicated pallas_call
            # would be pure pad/launch overhead at this size — per perf review)
            emb = feats @ p["w"] + p["b"]
        x_pad = x_pad.at[off:off + n, :emb.shape[1]].set(emb)

    # ---- edge index vectors, padded with -1 sentinels (match nothing) ------
    s = edge_index[:, 0].astype(jnp.int32)
    r = edge_index[:, 1].astype(jnp.int32)
    t = edge_index[:, 2].astype(jnp.int32)

    def pad_idx(v):
        return jnp.full((e_pad,), -1, jnp.int32).at[:num_edges].set(v)

    s_p, t_p, r_p = pad_idx(s), pad_idx(t), pad_idx(r)
    st_col = jnp.concatenate([s_p, t_p], axis=0).reshape(2 * e_pad, 1)
    r_col = r_p.reshape(e_pad, 1)

    # ---- per-edge degree normalization scale (layer invariant, tiny O(E)) --
    # Reference applies s_dinv[s]/t_dinv[t] pre-scatter and t_dinv/s_dinv
    # post-scatter; both directions collapse to the same per-edge factor
    # s_dinv[s[e]] * t_dinv[t[e]], computed once here in exact f32.
    if edge_norm:
        ones_e = jnp.ones((num_edges,), jnp.float32)
        s_deg = jnp.zeros((num_entities,), jnp.float32).at[s].add(ones_e)
        t_deg = jnp.zeros((num_entities,), jnp.float32).at[t].add(ones_e)
        s_dinv = jnp.where(s_deg > 0.0,
                           jax.lax.rsqrt(jnp.maximum(s_deg, 1.0)), 0.0)
        t_dinv = jnp.where(t_deg > 0.0,
                           jax.lax.rsqrt(jnp.maximum(t_deg, 1.0)), 0.0)
        edge_scale = s_dinv[s] * t_dinv[t]
    else:
        edge_scale = jnp.ones((num_edges,), jnp.float32)
    edge_scale_pad = jnp.zeros((e_pad, 1), jnp.float32).at[
        :num_edges, 0].set(edge_scale)

    # ---- fused CompGCN layers ----------------------------------------------
    fuse_256 = _mxu_is_256x256()
    x = x_pad
    rel_out = None
    for layer_idx in range(num_layers):
        lp = _pad_layer_params(params["layers"][layer_idx], d_pad, r_pad)
        d_out = conv_hidden[f"layer_{layer_idx}"]
        is_last = layer_idx == num_layers - 1
        x, rel_layer = compgcn_layer_call(
            x, lp, st_col, r_col, edge_scale_pad,
            apply_relu=not is_last, apply_ln=use_layer_norm, d_out=d_out,
            compute_rel=is_last, fuse_256=fuse_256,
            n_pad=n_pad, d_pad=d_pad, r_pad=r_pad)
        if rel_layer is not None:
            rel_out = rel_layer

    d_last = conv_hidden[f"layer_{num_layers - 1}"]
    return x[:num_entities, :d_last], rel_out[:2 * num_relations, :d_last]


# ----------------------------------------------------------------------------
# Example run
# ----------------------------------------------------------------------------

if __name__ == "__main__":
    key = jax.random.PRNGKey(0)
    k_param, k_feat, k_s, k_r, k_t = jax.random.split(key, 5)

    # model config (small, consistent with module semantics)
    in_channels_dict = {"paper": 6, "author": None}
    num_nodes_per_type = {"paper": 10, "author": 14}
    num_entities = 24
    num_relations = 3
    mlp_out = 32
    conv_hidden = {"layer_0": 32, "layer_1": 16}
    num_layers = 2
    num_edges = 40

    node_type_offset = {}
    off = 0
    for nt in in_channels_dict:
        node_type_offset[nt] = off
        off += num_nodes_per_type[nt]

    params = init_params(k_param, in_channels_dict, num_nodes_per_type,
                         mlp_out, conv_hidden, num_layers, num_relations)

    x_dict = {
        "paper": jax.random.normal(k_feat, (num_nodes_per_type["paper"], 6),
                                   jnp.float32),
        "author": None,
    }
    s_idx = jax.random.randint(k_s, (num_edges,), 0, num_entities)
    r_idx = jax.random.randint(k_r, (num_edges,), 0, 2 * num_relations)
    t_idx = jax.random.randint(k_t, (num_edges,), 0, num_entities)
    edge_index = jnp.stack([s_idx, r_idx, t_idx], axis=1).astype(jnp.int32)

    out, final_rel_emb = hetero_compgcn_forward(
        params, x_dict, edge_index, node_type_offset, num_nodes_per_type,
        num_entities, mlp_out, conv_hidden, num_layers, num_relations,
        use_layer_norm=True, edge_norm=True)

    out = jax.block_until_ready(out)
    final_rel_emb = jax.block_until_ready(final_rel_emb)

    assert out.shape == (num_entities, conv_hidden["layer_1"])
    assert final_rel_emb.shape == (2 * num_relations, conv_hidden["layer_1"])
    assert bool(jnp.all(jnp.isfinite(out)))
    assert bool(jnp.all(jnp.isfinite(final_rel_emb)))

    print("KERNEL_OK")
</pallas_src>

<mosaic_0001>
module attributes {stable_mosaic.version = 11 : i64} {
  func.func @_layer_kernel(%arg0: i32, %arg1: memref<256x1xi32, #tpu.memory_space<vmem>>, %arg2: memref<128x1xi32, #tpu.memory_space<vmem>>, %arg3: memref<128x1xf32, #tpu.memory_space<vmem>>, %arg4: memref<128x128xf32, #tpu.memory_space<vmem>>, %arg5: memref<128x128xbf16, #tpu.memory_space<vmem>>, %arg6: memref<128x128xbf16, #tpu.memory_space<vmem>>, %arg7: memref<128x128xbf16, #tpu.memory_space<vmem>>, %arg8: memref<128x128xbf16, #tpu.memory_space<vmem>>, %arg9: memref<1x128xf32, #tpu.memory_space<vmem>>, %arg10: memref<1x128xf32, #tpu.memory_space<vmem>>, %arg11: memref<1x128xf32, #tpu.memory_space<vmem>>, %arg12: memref<1x128xf32, #tpu.memory_space<vmem>>, %arg13: memref<128x128xf32, #tpu.memory_space<vmem>>) attributes {dimension_semantics = [#tpu.dimension_semantics<arbitrary>], iteration_bounds = array<i64: 1>, scalar_prefetch = 0 : i64, scratch_operands = 0 : i64, tpu.core_type = #tpu.core_type<tc>, window_params = [{pipeline_mode = #tpu.pipeline_mode<synchronous>, transform_indices = @transform_0, window_bounds = array<i64: 256, 1>}, {pipeline_mode = #tpu.pipeline_mode<synchronous>, transform_indices = @transform_1, window_bounds = array<i64: 128, 1>}, {pipeline_mode = #tpu.pipeline_mode<synchronous>, transform_indices = @transform_2, window_bounds = array<i64: 128, 1>}, {pipeline_mode = #tpu.pipeline_mode<synchronous>, transform_indices = @transform_3, window_bounds = array<i64: 128, 128>}, {pipeline_mode = #tpu.pipeline_mode<synchronous>, transform_indices = @transform_4, window_bounds = array<i64: 128, 128>}, {pipeline_mode = #tpu.pipeline_mode<synchronous>, transform_indices = @transform_5, window_bounds = array<i64: 128, 128>}, {pipeline_mode = #tpu.pipeline_mode<synchronous>, transform_indices = @transform_6, window_bounds = array<i64: 128, 128>}, {pipeline_mode = #tpu.pipeline_mode<synchronous>, transform_indices = @transform_7, window_bounds = array<i64: 128, 128>}, {pipeline_mode = #tpu.pipeline_mode<synchronous>, transform_indices = @transform_8, window_bounds = array<i64: 1, 128>}, {pipeline_mode = #tpu.pipeline_mode<synchronous>, transform_indices = @transform_9, window_bounds = array<i64: 1, 128>}, {pipeline_mode = #tpu.pipeline_mode<synchronous>, transform_indices = @transform_10, window_bounds = array<i64: 1, 128>}, {pipeline_mode = #tpu.pipeline_mode<synchronous>, transform_indices = @transform_11, window_bounds = array<i64: 1, 128>}, {pipeline_mode = #tpu.pipeline_mode<synchronous>, transform_indices = @transform_12, window_bounds = array<i64: 128, 128>}]} {
    %c0 = arith.constant 0 : index
    %c0_0 = arith.constant 0 : index
    %0 = vector.load %arg4[%c0, %c0_0] : memref<128x128xf32, #tpu.memory_space<vmem>>, vector<128x128xf32>
    %1 = arith.truncf %0 : vector<128x128xf32> to vector<128x128xbf16>
    %c0_1 = arith.constant 0 : index
    %c0_2 = arith.constant 0 : index
    %2 = vector.load %arg5[%c0_1, %c0_2] : memref<128x128xbf16, #tpu.memory_space<vmem>>, vector<128x128xbf16>
    %c0_3 = arith.constant 0 : index
    %c0_4 = arith.constant 0 : index
    %3 = vector.load %arg1[%c0_3, %c0_4] : memref<256x1xi32, #tpu.memory_space<vmem>>, vector<256x1xi32>
    %4 = tpu.iota {dimensions = array<i32: 1>} : vector<256x128xi32>
    %5 = vector.broadcast %3 : vector<256x1xi32> to vector<256x128xi32>
    %6 = arith.cmpi eq, %4, %5 : vector<256x128xi32>
    %cst = arith.constant 1.000000e+00 : f32
    %cst_5 = arith.constant 0.000000e+00 : f32
    %7 = vector.broadcast %cst : f32 to vector<256x128xf32>
    %8 = vector.broadcast %cst_5 : f32 to vector<256x128xf32>
    %9 = arith.select %6, %7, %8 : vector<256x128xi1>, vector<256x128xf32>
    %10 = arith.truncf %9 : vector<256x128xf32> to vector<256x128xbf16>
    %c0_6 = arith.constant 0 : index
    %c0_7 = arith.constant 0 : index
    %11 = vector.load %arg2[%c0_6, %c0_7] : memref<128x1xi32, #tpu.memory_space<vmem>>, vector<128x1xi32>
    %12 = tpu.iota {dimensions = array<i32: 1>} : vector<128x128xi32>
    %13 = vector.broadcast %11 : vector<128x1xi32> to vector<128x128xi32>
    %14 = arith.cmpi eq, %12, %13 : vector<128x128xi32>
    %cst_8 = arith.constant 1.000000e+00 : f32
    %cst_9 = arith.constant 0.000000e+00 : f32
    %15 = vector.broadcast %cst_8 : f32 to vector<128x128xf32>
    %16 = vector.broadcast %cst_9 : f32 to vector<128x128xf32>
    %17 = arith.select %14, %15, %16 : vector<128x128xi1>, vector<128x128xf32>
    %18 = arith.truncf %17 : vector<128x128xf32> to vector<128x128xbf16>
    %c0_10 = arith.constant 0 : index
    %c0_11 = arith.constant 0 : index
    %19 = vector.load %arg3[%c0_10, %c0_11] : memref<128x1xf32, #tpu.memory_space<vmem>>, vector<128x1xf32>
    %cst_12 = arith.constant dense<0.000000e+00> : vector<256x128xf32>
    %20 = tpu.matmul %10, %1, %cst_12 {dimension_numbers = #tpu.dot_dimension_numbers<[1], [0], [0], [1], [0, 0, 1, 1], [], []>} : vector<256x128xbf16>, vector<128x128xbf16>, vector<256x128xf32> -> vector<256x128xf32>
    %21 = vector.extract_strided_slice %20 {offsets = [0, 0], sizes = [128, 128], strides = [1, 1]} : vector<256x128xf32> to vector<128x128xf32>
    %22 = vector.extract_strided_slice %20 {offsets = [128, 0], sizes = [128, 128], strides = [1, 1]} : vector<256x128xf32> to vector<128x128xf32>
    %cst_13 = arith.constant dense<0.000000e+00> : vector<128x128xf32>
    %23 = tpu.matmul %18, %2, %cst_13 {dimension_numbers = #tpu.dot_dimension_numbers<[1], [0], [0], [1], [0, 0, 1, 1], [], []>} : vector<128x128xbf16>, vector<128x128xbf16>, vector<128x128xf32> -> vector<128x128xf32>
    %24 = arith.subf %21, %23 : vector<128x128xf32>
    %25 = vector.broadcast %19 : vector<128x1xf32> to vector<128x128xf32>
    %26 = arith.mulf %24, %25 : vector<128x128xf32>
    %27 = arith.subf %22, %23 : vector<128x128xf32>
    %28 = vector.broadcast %19 : vector<128x1xf32> to vector<128x128xf32>
    %29 = arith.mulf %27, %28 : vector<128x128xf32>
    %30 = arith.truncf %26 : vector<128x128xf32> to vector<128x128xbf16>
    %c0_14 = arith.constant 0 : index
    %c0_15 = arith.constant 0 : index
    %31 = vector.load %arg6[%c0_14, %c0_15] : memref<128x128xbf16, #tpu.memory_space<vmem>>, vector<128x128xbf16>
    %cst_16 = arith.constant dense<0.000000e+00> : vector<128x128xf32>
    %32 = tpu.matmul %30, %31, %cst_16 {dimension_numbers = #tpu.dot_dimension_numbers<[1], [0], [0], [1], [0, 0, 1, 1], [], []>} : vector<128x128xbf16>, vector<128x128xbf16>, vector<128x128xf32> -> vector<128x128xf32>
    %33 = arith.truncf %29 : vector<128x128xf32> to vector<128x128xbf16>
    %c0_17 = arith.constant 0 : index
    %c0_18 = arith.constant 0 : index
    %34 = vector.load %arg7[%c0_17, %c0_18] : memref<128x128xbf16, #tpu.memory_space<vmem>>, vector<128x128xbf16>
    %cst_19 = arith.constant dense<0.000000e+00> : vector<128x128xf32>
    %35 = tpu.matmul %33, %34, %cst_19 {dimension_numbers = #tpu.dot_dimension_numbers<[1], [0], [0], [1], [0, 0, 1, 1], [], []>} : vector<128x128xbf16>, vector<128x128xbf16>, vector<128x128xf32> -> vector<128x128xf32>
    %36 = arith.truncf %35 : vector<128x128xf32> to vector<128x128xbf16>
    %37 = arith.truncf %32 : vector<128x128xf32> to vector<128x128xbf16>
    %38 = tpu.concatenate %36, %37 in 0 : vector<128x128xbf16>, vector<128x128xbf16> -> vector<256x128xbf16>
    %cst_20 = arith.constant dense<0.000000e+00> : vector<128x128xf32>
    %39 = tpu.matmul %10, %38, %cst_20 {dimension_numbers = #tpu.dot_dimension_numbers<[0], [0], [1], [1], [0, 1, 1, 1], [], []>} : vector<256x128xbf16>, vector<256x128xbf16>, vector<128x128xf32> -> vector<128x128xf32>
    %c0_21 = arith.constant 0 : index
    %c0_22 = arith.constant 0 : index
    %40 = vector.load %arg9[%c0_21, %c0_22] : memref<1x128xf32, #tpu.memory_space<vmem>>, vector<1x128xf32>
    %41 = vector.broadcast %40 : vector<1x128xf32> to vector<128x128xf32>
    %42 = arith.subf %0, %41 : vector<128x128xf32>
    %43 = arith.truncf %42 : vector<128x128xf32> to vector<128x128xbf16>
    %c0_23 = arith.constant 0 : index
    %c0_24 = arith.constant 0 : index
    %44 = vector.load %arg8[%c0_23, %c0_24] : memref<128x128xbf16, #tpu.memory_space<vmem>>, vector<128x128xbf16>
    %cst_25 = arith.constant dense<0.000000e+00> : vector<128x128xf32>
    %45 = tpu.matmul %43, %44, %cst_25 {dimension_numbers = #tpu.dot_dimension_numbers<[1], [0], [0], [1], [0, 0, 1, 1], [], []>} : vector<128x128xbf16>, vector<128x128xbf16>, vector<128x128xf32> -> vector<128x128xf32>
    %46 = arith.addf %39, %45 : vector<128x128xf32>
    %cst_26 = arith.constant 0.333333343 : f32
    %47 = vector.broadcast %cst_26 : f32 to vector<128x128xf32>
    %48 = arith.mulf %46, %47 : vector<128x128xf32>
    %c0_27 = arith.constant 0 : index
    %c0_28 = arith.constant 0 : index
    %49 = vector.load %arg10[%c0_27, %c0_28] : memref<1x128xf32, #tpu.memory_space<vmem>>, vector<1x128xf32>
    %50 = vector.broadcast %49 : vector<1x128xf32> to vector<128x128xf32>
    %51 = arith.addf %48, %50 : vector<128x128xf32>
    %cst_29 = arith.constant 0.000000e+00 : f32
    %52 = vector.broadcast %cst_29 : f32 to vector<128x128xf32>
    %53 = arith.maximumf %51, %52 : vector<128x128xf32>
    %54 = tpu.iota {dimensions = array<i32: 1>} : vector<128x128xi32>
    %c32_i32 = arith.constant 32 : i32
    %55 = vector.broadcast %c32_i32 : i32 to vector<128x128xi32>
    %56 = arith.cmpi slt, %54, %55 : vector<128x128xi32>
    %57 = arith.extui %56 : vector<128x128xi1> to vector<128x128xi32>
    %58 = arith.sitofp %57 : vector<128x128xi32> to vector<128x128xf32>
    %59 = arith.mulf %53, %58 : vector<128x128xf32>
    %cst_30 = arith.constant dense<0.000000e+00> : vector<128xf32>
    %60 = vector.multi_reduction <add>, %59, %cst_30 [1] : vector<128x128xf32> to vector<128xf32>
    %61 = vector.shape_cast %60 : vector<128xf32> to vector<128x1xf32>
    %cst_31 = arith.constant 3.125000e-02 : f32
    %62 = vector.broadcast %cst_31 : f32 to vector<128x1xf32>
    %63 = arith.mulf %61, %62 : vector<128x1xf32>
    %64 = vector.broadcast %63 : vector<128x1xf32> to vector<128x128xf32>
    %65 = arith.subf %53, %64 : vector<128x128xf32>
    %66 = arith.mulf %65, %58 : vector<128x128xf32>
    %67 = arith.mulf %66, %66 : vector<128x128xf32>
    %cst_32 = arith.constant dense<0.000000e+00> : vector<128xf32>
    %68 = vector.multi_reduction <add>, %67, %cst_32 [1] : vector<128x128xf32> to vector<128xf32>
    %69 = vector.shape_cast %68 : vector<128xf32> to vector<128x1xf32>
    %cst_33 = arith.constant 3.125000e-02 : f32
    %70 = vector.broadcast %cst_33 : f32 to vector<128x1xf32>
    %71 = arith.mulf %69, %70 : vector<128x1xf32>
    %cst_34 = arith.constant 9.99999974E-6 : f32
    %72 = vector.broadcast %cst_34 : f32 to vector<128x1xf32>
    %73 = arith.addf %71, %72 : vector<128x1xf32>
    %74 = math.rsqrt %73 : vector<128x1xf32>
    %75 = vector.broadcast %74 : vector<128x1xf32> to vector<128x128xf32>
    %76 = arith.mulf %66, %75 : vector<128x128xf32>
    %c0_35 = arith.constant 0 : index
    %c0_36 = arith.constant 0 : index
    %77 = vector.load %arg11[%c0_35, %c0_36] : memref<1x128xf32, #tpu.memory_space<vmem>>, vector<1x128xf32>
    %78 = vector.broadcast %77 : vector<1x128xf32> to vector<128x128xf32>
    %79 = arith.mulf %76, %78 : vector<128x128xf32>
    %c0_37 = arith.constant 0 : index
    %c0_38 = arith.constant 0 : index
    %80 = vector.load %arg12[%c0_37, %c0_38] : memref<1x128xf32, #tpu.memory_space<vmem>>, vector<1x128xf32>
    %81 = vector.broadcast %80 : vector<1x128xf32> to vector<128x128xf32>
    %82 = arith.addf %79, %81 : vector<128x128xf32>
    %c0_39 = arith.constant 0 : index
    %c0_40 = arith.constant 0 : index
    %83 = vector.load %arg13[%c0_39, %c0_40] : memref<128x128xf32, #tpu.memory_space<vmem>>, vector<128x128xf32>
    tpu.vector_store %arg13[%c0_39, %c0_40], %82 {strides = array<i32>} : memref<128x128xf32, #tpu.memory_space<vmem>>, vector<128x128xf32>,
    return
  }
  func.func @transform_0(%arg0: i32) -> (i32, i32) {
    %c0_i32 = arith.constant 0 : i32
    %c0_i32_0 = arith.constant 0 : i32
    %c0_i32_1 = arith.constant 0 : i32
    return %c0_i32, %c0_i32_0 : i32, i32
  }
  func.func @transform_1(%arg0: i32) -> (i32, i32) {
    %c0_i32 = arith.constant 0 : i32
    %c0_i32_0 = arith.constant 0 : i32
    %c0_i32_1 = arith.constant 0 : i32
    return %c0_i32, %c0_i32_0 : i32, i32
  }
  func.func @transform_2(%arg0: i32) -> (i32, i32) {
    %c0_i32 = arith.constant 0 : i32
    %c0_i32_0 = arith.constant 0 : i32
    %c0_i32_1 = arith.constant 0 : i32
    return %c0_i32, %c0_i32_0 : i32, i32
  }
  func.func @transform_3(%arg0: i32) -> (i32, i32) {
    %c0_i32 = arith.constant 0 : i32
    %c0_i32_0 = arith.constant 0 : i32
    %c0_i32_1 = arith.constant 0 : i32
    return %c0_i32, %c0_i32_0 : i32, i32
  }
  func.func @transform_4(%arg0: i32) -> (i32, i32) {
    %c0_i32 = arith.constant 0 : i32
    %c0_i32_0 = arith.constant 0 : i32
    %c0_i32_1 = arith.constant 0 : i32
    return %c0_i32, %c0_i32_0 : i32, i32
  }
  func.func @transform_5(%arg0: i32) -> (i32, i32) {
    %c0_i32 = arith.constant 0 : i32
    %c0_i32_0 = arith.constant 0 : i32
    %c0_i32_1 = arith.constant 0 : i32
    return %c0_i32, %c0_i32_0 : i32, i32
  }
  func.func @transform_6(%arg0: i32) -> (i32, i32) {
    %c0_i32 = arith.constant 0 : i32
    %c0_i32_0 = arith.constant 0 : i32
    %c0_i32_1 = arith.constant 0 : i32
    return %c0_i32, %c0_i32_0 : i32, i32
  }
  func.func @transform_7(%arg0: i32) -> (i32, i32) {
    %c0_i32 = arith.constant 0 : i32
    %c0_i32_0 = arith.constant 0 : i32
    %c0_i32_1 = arith.constant 0 : i32
    return %c0_i32, %c0_i32_0 : i32, i32
  }
  func.func @transform_8(%arg0: i32) -> (i32, i32) {
    %c0_i32 = arith.constant 0 : i32
    %c0_i32_0 = arith.constant 0 : i32
    %c0_i32_1 = arith.constant 0 : i32
    return %c0_i32, %c0_i32_0 : i32, i32
  }
  func.func @transform_9(%arg0: i32) -> (i32, i32) {
    %c0_i32 = arith.constant 0 : i32
    %c0_i32_0 = arith.constant 0 : i32
    %c0_i32_1 = arith.constant 0 : i32
    return %c0_i32, %c0_i32_0 : i32, i32
  }
  func.func @transform_10(%arg0: i32) -> (i32, i32) {
    %c0_i32 = arith.constant 0 : i32
    %c0_i32_0 = arith.constant 0 : i32
    %c0_i32_1 = arith.constant 0 : i32
    return %c0_i32, %c0_i32_0 : i32, i32
  }
  func.func @transform_11(%arg0: i32) -> (i32, i32) {
    %c0_i32 = arith.constant 0 : i32
    %c0_i32_0 = arith.constant 0 : i32
    %c0_i32_1 = arith.constant 0 : i32
    return %c0_i32, %c0_i32_0 : i32, i32
  }
  func.func @transform_12(%arg0: i32) -> (i32, i32) {
    %c0_i32 = arith.constant 0 : i32
    %c0_i32_0 = arith.constant 0 : i32
    %c0_i32_1 = arith.constant 0 : i32
    return %c0_i32, %c0_i32_0 : i32, i32
  }
}

</mosaic_0001>

<bundles_post_ra>
// kernel: tpu_custom_call.1
= control target key start
LH: loop header
LB: loop body
LE: loop exit
PB: predicated region body
PF: predicated region fallthrough
CT: control target
= control target key end

     0   :  { %v2422_v2 = vmov 0   ;;  %s3468_s0 = inlined_call_operand.vmem [shape: s32[256,1], index: 0, kind: input, shape index: {}]   ;;  %s3469_s1 = inlined_call_operand.vmem [shape: s32[128,1], index: 1, kind: input, shape index: {}]   ;;  %s3470_s2 = inlined_call_operand.vmem [shape: f32[128,1], index: 2, kind: input, shape index: {}]   ;;  %s3471_s3 = inlined_call_operand.vmem [shape: f32[128,128], index: 3, kind: input, shape index: {}]   ;;  %s3472_s4 = inlined_call_operand.vmem [shape: bf16[128,128], index: 4, kind: input, shape index: {}]   ;;  %s3473_s5 = inlined_call_operand.vmem [shape: bf16[128,128], index: 5, kind: input, shape index: {}]   ;;  %s3474_s6 = inlined_call_operand.vmem [shape: bf16[128,128], index: 6, kind: input, shape index: {}]   ;;  %s3475_s7 = inlined_call_operand.vmem [shape: bf16[128,128], index: 7, kind: input, shape index: {}]   ;;  %s3476_s8 = inlined_call_operand.vmem [shape: f32[1,128], index: 8, kind: input, shape index: {}]   ;;  %s3477_s9 = inlined_call_operand.vmem [shape: f32[1,128], index: 9, kind: input, shape index: {}]   ;;  %s3478_s10 = inlined_call_operand.vmem [shape: f32[1,128], index: 10, kind: input, shape index: {}]   ;;  %s3479_s11 = inlined_call_operand.vmem [shape: f32[1,128], index: 11, kind: input, shape index: {}]   ;;  %s3480_s12 = inlined_call_operand.hbm [shape: f32[128,128], index: 12, kind: output, shape index: {}]  }
   0x1   :  { %v101_v0 = vld [vmem:[%s3468_s0 + $0x90] sm:$0xff]  ;;  %v99_v1 = vld [vmem:[%s3468_s0 + $0x80] sm:$0xff]  ;;  %2318 = vset.pattern.permute.xlu1 %v2422_v2  ;;  %2317 = vset.pattern.permute.xlu0 %v2422_v2  ;;  %v102_v3 = vld [vmem:[%s3468_s0 + $0x98] sm:$0xff] }
   0x2   :  { %172 = vperm.xlu1 %2318, %v101_v0   ;;  %166 = vperm.xlu0 %2317, %v99_v1   ;;  %v100_v4 = vld [vmem:[%s3468_s0 + $0x88] sm:$0xff]  ;;  %v103_v6 = vld [vmem:[%s3468_s0 + $0xa0] sm:$0xff]  ;;  %v106_v7 = vld [vmem:[%s3468_s0 + $0xb8] sm:$0xff] }
   0x3   :  { %v104_v5 = vld [vmem:[%s3468_s0 + $0xa8] sm:$0xff]  ;;  %v105_v8 = vld [vmem:[%s3468_s0 + $0xb0] sm:$0xff]  ;;  %v107_v10 = vld [vmem:[%s3468_s0 + $0xc0] sm:$0xff] }
   0x4   :  { %v108_v9 = vld [vmem:[%s3468_s0 + $0xc8] sm:$0xff]  ;;  %v43_v11 = vld [vmem:[%s3471_s3] sm:$0xff]  ;;  %v110_v13 = vld [vmem:[%s3468_s0 + $0xd8] sm:$0xff] }
   0x5   :  { %v44_v12 = vld [vmem:[%s3471_s3 + $0x8] sm:$0xff]  ;;  %v45_v15 = vld [vmem:[%s3471_s3 + $0x10] sm:$0xff]  ;;  %v46_v17 = vld [vmem:[%s3471_s3 + $0x18] sm:$0xff] }
   0x6   :  { %175 = vperm.xlu1 %2318, %v102_v3   ;;  %169 = vperm.xlu0 %2317, %v100_v4   ;;  %v59_v14 = vpack.c.bf16 %v44_v12, %v43_v11  ;;  %v109_v16 = vld [vmem:[%s3468_s0 + $0xd0] sm:$0xff]  ;;  %v1954_v18 = vld [vmem:[%s3476_s8] ss:$0 sm:$0xff]  ;;  %v60_v19 = vpack.c.bf16 %v46_v17, %v45_v15  ;;  %v48_v23 = vld [vmem:[%s3471_s3 + $0x28] sm:$0xff] }
   0x7   :  { %v1226_v20 = vsub.f32 %v45_v15, %v1954_v18  ;;  %v1227_v21 = vsub.f32 %v46_v17, %v1954_v18  ;;  %v47_v22 = vld [vmem:[%s3471_s3 + $0x20] sm:$0xff]  ;;  %v112_v25 = vld [vmem:[%s3468_s0 + $0xe8] sm:$0xff]  ;;  %v49_v28 = vld [vmem:[%s3471_s3 + $0x30] sm:$0xff] }
   0x8   :  { %2295 = vmatprep.subr.bf16.mxu1 %v59_v14  ;;  %2119 = vmatprep.subr.bf16.mxu0 %v59_v14  ;;  %v111_v26 = vld [vmem:[%s3468_s0 + $0xe0] sm:$0xff]  ;;  %v61_v27 = vpack.c.bf16 %v48_v23, %v47_v22  ;;  %v50_v29 = vld [vmem:[%s3471_s3 + $0x38] sm:$0xff]  ;;  %v113_v31 = vld [vmem:[%s3468_s0 + $0xf0] sm:$0xff] }
   0x9   :  { %2303 = vmatpush3.bf16.msra.mxu1 %v59_v14  ;;  %2120 = vmatpush3.bf16.msra.mxu0 %v59_v14  ;;  %v2550_v24 = vpack.c.bf16 %v1227_v21, %v1226_v20  ;;  %v114_v30 = vld [vmem:[%s3468_s0 + $0xf8] sm:$0xff]  ;;  %v62_v32 = vpack.c.bf16 %v50_v29, %v49_v28  ;;  %v51_v33 = vld [vmem:[%s3471_s3 + $0x40] sm:$0xff]  ;;  %v52_v34 = vld [vmem:[%s3471_s3 + $0x48] sm:$0xff] }
   0xa   :  { %181 = vperm.xlu1 %2318, %v104_v5   ;;  %178 = vperm.xlu0 %2317, %v103_v6   ;;  %v84_v35 = vld [vmem:[%s3468_s0 + $0x8] sm:$0xff]  ;;  %v83_v36 = vld [vmem:[%s3468_s0] sm:$0xff]  ;;  %v53_v37 = vld [vmem:[%s3471_s3 + $0x50] sm:$0xff]  ;;  %v63_v38 = vpack.c.bf16 %v52_v34, %v51_v33 }
   0xb   :  { %2296 = vmatprep.subr.bf16.mxu1 %v60_v19  ;;  %2121 = vmatprep.subr.bf16.mxu0 %v60_v19  ;;  %v54_v39 = vld [vmem:[%s3471_s3 + $0x58] sm:$0xff]  ;;  %v294_v40 = vld [vmem:[%s3469_s1 + $0x8] sm:$0xff]  ;;  %v293_v41 = vld [vmem:[%s3469_s1] sm:$0xff] }
   0xc   :  { %v55_v42 = vld [vmem:[%s3471_s3 + $0x60] sm:$0xff]  ;;  %v64_v43 = vpack.c.bf16 %v54_v39, %v53_v37  ;;  %v56_v44 = vld [vmem:[%s3471_s3 + $0x68] sm:$0xff]  ;;  %v86_v45 = vld [vmem:[%s3468_s0 + $0x18] sm:$0xff] }
   0xd   :  { %2304 = vmatpush3.bf16.msra.mxu1 %v60_v19  ;;  %2122 = vmatpush3.bf16.msra.mxu0 %v60_v19  ;;  %v85_v46 = vld [vmem:[%s3468_s0 + $0x10] sm:$0xff]  ;;  %v65_v48 = vpack.c.bf16 %v56_v44, %v55_v42  ;;  %v58_v49 = vld [vmem:[%s3471_s3 + $0x78] sm:$0xff]  ;;  %v88_v53 = vld [vmem:[%s3468_s0 + $0x28] sm:$0xff] }
   0xe   :  { %187 = vperm.xlu1 %2318, %v106_v7   ;;  %184 = vperm.xlu0 %2317, %v105_v8   ;;  %v57_v47 = vld [vmem:[%s3471_s3 + $0x70] sm:$0xff]  ;;  %v296_v50 = vld [vmem:[%s3469_s1 + $0x18] sm:$0xff]  ;;  %v87_v54 = vld [vmem:[%s3468_s0 + $0x20] sm:$0xff] }
   0xf   :  { %2297 = vmatprep.subr.bf16.mxu1 %v61_v27  ;;  %2123 = vmatprep.subr.bf16.mxu0 %v61_v27  ;;  %v295_v51 = vld [vmem:[%s3469_s1 + $0x10] sm:$0xff]  ;;  %v66_v52 = vpack.c.bf16 %v58_v49, %v57_v47  ;;  %v2627_v55 = vld [vmem:[%s3472_s4] sm:$0xff]   ;;  %v298_v56 = vld [vmem:[%s3469_s1 + $0x28] sm:$0xff] }
  0x10   :  { %v297_v57 = vld [vmem:[%s3469_s1 + $0x20] sm:$0xff] }
  0x11   :  { %2305 = vmatpush3.bf16.msra.mxu1 %v61_v27  ;;  %2124 = vmatpush3.bf16.msra.mxu0 %v61_v27 }
  0x12   :  { %193 = vperm.xlu1 %2318, %v108_v9   ;;  %190 = vperm.xlu0 %2317, %v107_v10  }
  0x13   :  { %2298 = vmatprep.subr.bf16.mxu1 %v62_v32  ;;  %2125 = vmatprep.subr.bf16.mxu0 %v62_v32 }
  0x15   :  { %2306 = vmatpush3.bf16.msra.mxu1 %v62_v32  ;;  %2126 = vmatpush3.bf16.msra.mxu0 %v62_v32 }
  0x16   :  { %199 = vperm.xlu1 %2318, %v110_v13   ;;  %196 = vperm.xlu0 %2317, %v109_v16  }
  0x17   :  { %2299 = vmatprep.subr.bf16.mxu1 %v63_v38  ;;  %2127 = vmatprep.subr.bf16.mxu0 %v63_v38 }
  0x19   :  { %2307 = vmatpush3.bf16.msra.mxu1 %v63_v38  ;;  %2128 = vmatpush3.bf16.msra.mxu0 %v63_v38 }
  0x1a   :  { %205 = vperm.xlu1 %2318, %v112_v25   ;;  %202 = vperm.xlu0 %2317, %v111_v26  }
  0x1b   :  { %2300 = vmatprep.subr.bf16.mxu1 %v64_v43  ;;  %2129 = vmatprep.subr.bf16.mxu0 %v64_v43 }
  0x1d   :  { %2308 = vmatpush3.bf16.msra.mxu1 %v64_v43  ;;  %2130 = vmatpush3.bf16.msra.mxu0 %v64_v43 }
  0x1e   :  { %211 = vperm.xlu1 %2318, %v114_v30   ;;  %208 = vperm.xlu0 %2317, %v113_v31  }
  0x1f   :  { %2301 = vmatprep.subr.bf16.mxu1 %v65_v48  ;;  %2131 = vmatprep.subr.bf16.mxu0 %v65_v48 }
  0x21   :  { %2309 = vmatpush3.bf16.msra.mxu1 %v65_v48  ;;  %2132 = vmatpush3.bf16.msra.mxu0 %v65_v48 }
  0x22   :  { %121 = vperm.xlu1 %2318, %v84_v35   ;;  %118 = vperm.xlu0 %2317, %v83_v36  }
  0x23   :  { %2302 = vmatprep.subr.bf16.mxu1 %v66_v52  ;;  %2133 = vmatprep.subr.bf16.mxu0 %v66_v52 }
  0x25   :  { %2310 = vmatpush3.bf16.msra.mxu1 %v66_v52  ;;  %2134 = vmatpush3.bf16.msra.mxu0 %v66_v52 }
  0x26   :  { %313 = vperm.xlu1 %2318, %v294_v40   ;;  %310 = vperm.xlu0 %2317, %v293_v41  }
  0x27   :  { %2167 = vmatprep.subr.bf16.mxu1 %v2627_v55 }
  0x2a   :  { %127 = vperm.xlu1 %2318, %v86_v45   ;;  %124 = vperm.xlu0 %2317, %v85_v46  }
  0x2e   :  { %319 = vperm.xlu1 %2318, %v296_v50   ;;  %316 = vperm.xlu0 %2317, %v295_v51  }
  0x32   :  { %133 = vperm.xlu1 %2318, %v88_v53   ;;  %130 = vperm.xlu0 %2317, %v87_v54  }
  0x33   :  { %17 = vsyncpa [#allocation3], 0  ;;  %v90_v58 = vld [vmem:[%s3468_s0 + $0x38] sm:$0xff]  ;;  %v89_v59 = vld [vmem:[%s3468_s0 + $0x30] sm:$0xff]  ;;  %v115_v31 = vlaneseq  ;;  %v2423_v38 = vmov 1.0|1.0  }
  0x34   :  { %v300_v60 = vld [vmem:[%s3469_s1 + $0x38] sm:$0xff]  ;;  %v299_v61 = vld [vmem:[%s3469_s1 + $0x30] sm:$0xff]  ;;  %v92_v62 = vld [vmem:[%s3468_s0 + $0x48] sm:$0xff]  ;;  %v2424_v50 = vmov 0.0  }
  0x35   :  { %v91_v63 = vld [vmem:[%s3468_s0 + $0x40] sm:$0xff]  ;;  %v302_v0 = vld [vmem:[%s3469_s1 + $0x48] sm:$0xff]  ;;  %v94_v2 = vld [vmem:[%s3468_s0 + $0x58] sm:$0xff]  ;;  %v2746_v34 = vand.u32 127, %v115_v31 }
  0x36   :  { %325 = vperm.xlu1 %2318, %v298_v56   ;;  %322 = vperm.xlu0 %2317, %v297_v57   ;;  %v301_v1 = vld [vmem:[%s3469_s1 + $0x40] sm:$0xff]  ;;  %v93_v3 = vld [vmem:[%s3468_s0 + $0x50] sm:$0xff]  ;;  %v304_v4 = vld [vmem:[%s3469_s1 + $0x58] sm:$0xff] }
  0x37   :  { %v303_v5 = vld [vmem:[%s3469_s1 + $0x50] sm:$0xff]  ;;  %v96_v6 = vld [vmem:[%s3468_s0 + $0x68] sm:$0xff]  ;;  %v95_v7 = vld [vmem:[%s3468_s0 + $0x60] sm:$0xff] }
  0x38   :  { %v306_v8 = vld [vmem:[%s3469_s1 + $0x68] sm:$0xff]  ;;  %v305_v9 = vld [vmem:[%s3469_s1 + $0x60] sm:$0xff]  ;;  %v98_v10 = vld [vmem:[%s3468_s0 + $0x78] sm:$0xff] }
  0x39   :  { %v97_v11 = vld [vmem:[%s3468_s0 + $0x70] sm:$0xff]  ;;  %v308_v12 = vld [vmem:[%s3469_s1 + $0x78] sm:$0xff]  ;;  %v398_v14 = vld [vmem:[%s3470_s2 + $0x8] sm:$0xff] }
  0x3a   :  { %139 = vperm.xlu1 %2318, %v90_v58   ;;  %136 = vperm.xlu0 %2317, %v89_v59   ;;  %v307_v13 = vld [vmem:[%s3469_s1 + $0x70] sm:$0xff]  ;;  %v397_v15 = vld [vmem:[%s3470_s2] sm:$0xff]  ;;  %v400_v16 = vld [vmem:[%s3470_s2 + $0x18] sm:$0xff] }
  0x3b   :  { %v399_v17 = vld [vmem:[%s3470_s2 + $0x10] sm:$0xff]  ;;  %v402_v18 = vld [vmem:[%s3470_s2 + $0x28] sm:$0xff]  ;;  %v401_v19 = vld [vmem:[%s3470_s2 + $0x20] sm:$0xff] }
  0x3c   :  { %v404_v20 = vld [vmem:[%s3470_s2 + $0x38] sm:$0xff]  ;;  %v403_v21 = vld [vmem:[%s3470_s2 + $0x30] sm:$0xff]  ;;  %v406_v22 = vld [vmem:[%s3470_s2 + $0x48] sm:$0xff] }
  0x3d   :  { %v405_v23 = vld [vmem:[%s3470_s2 + $0x40] sm:$0xff]  ;;  %v408_v25 = vld [vmem:[%s3470_s2 + $0x58] sm:$0xff]  ;;  %v407_v26 = vld [vmem:[%s3470_s2 + $0x50] sm:$0xff] }
  0x3e   :  { %331 = vperm.xlu1 %2318, %v300_v60   ;;  %328 = vperm.xlu0 %2317, %v299_v61   ;;  %v410_v27 = vld [vmem:[%s3470_s2 + $0x68] sm:$0xff]  ;;  %v409_v28 = vld [vmem:[%s3470_s2 + $0x60] sm:$0xff]  ;;  %v412_v29 = vld [vmem:[%s3470_s2 + $0x78] sm:$0xff] }
  0x3f   :  { %v411_v30 = vld [vmem:[%s3470_s2 + $0x70] sm:$0xff]  ;;  %v2320_v37 = vld [vmem:[%s3472_s4 + $0x8] sm:$0xff]   ;;  %v2322_v44 = vld [vmem:[%s3472_s4 + $0x18] sm:$0xff]  }
  0x40   :  { %v2321_v41 = vld [vmem:[%s3472_s4 + $0x10] sm:$0xff]   ;;  %v2323_v47 = vld [vmem:[%s3472_s4 + $0x20] sm:$0xff]  }
  0x41   :  { %v2325_v58 = vld [vmem:[%s3472_s4 + $0x30] sm:$0xff]  }
  0x42   :  { %145 = vperm.xlu1 %2318, %v92_v62   ;;  %142 = vperm.xlu0 %2317, %v91_v63  }
  0x46   :  { %337 = vperm.xlu1 %2318, %v302_v0   ;;  %334 = vperm.xlu0 %2317, %v301_v1  }
  0x4a   :  { %151 = vperm.xlu1 %2318, %v94_v2   ;;  %148 = vperm.xlu0 %2317, %v93_v3   ;;  %v2326_v3 = vld [vmem:[%s3472_s4 + $0x38] sm:$0xff]  }
  0x4e   :  { %343 = vperm.xlu1 %2318, %v304_v4   ;;  %340 = vperm.xlu0 %2317, %v303_v5  }
  0x52   :  { %157 = vperm.xlu1 %2318, %v96_v6   ;;  %154 = vperm.xlu0 %2317, %v95_v7  }
  0x56   :  { %349 = vperm.xlu1 %2318, %v306_v8   ;;  %346 = vperm.xlu0 %2317, %v305_v9  }
  0x5a   :  { %163 = vperm.xlu1 %2318, %v98_v10   ;;  %160 = vperm.xlu0 %2317, %v97_v11  }
  0x5e   :  { %355 = vperm.xlu1 %2318, %v308_v12   ;;  %352 = vperm.xlu0 %2317, %v307_v13  }
  0x62   :  { %742 = vperm.xlu1 %2318, %v398_v14   ;;  %737 = vperm.xlu0 %2317, %v397_v15  }
  0x66   :  { %752 = vperm.xlu1 %2318, %v400_v16   ;;  %747 = vperm.xlu0 %2317, %v399_v17  }
  0x6a   :  { %762 = vperm.xlu1 %2318, %v402_v18   ;;  %757 = vperm.xlu0 %2317, %v401_v19  }
  0x6e   :  { %772 = vperm.xlu1 %2318, %v404_v20   ;;  %767 = vperm.xlu0 %2317, %v403_v21  }
  0x72   :  { %782 = vperm.xlu1 %2318, %v406_v22   ;;  %777 = vperm.xlu0 %2317, %v405_v23  }
  0x76   :  { %792 = vperm.xlu1 %2318, %v408_v25   ;;  %787 = vperm.xlu0 %2317, %v407_v26  }
  0x7a   :  { %802 = vperm.xlu1 %2318, %v410_v27   ;;  %797 = vperm.xlu0 %2317, %v409_v28  }
  0x7e   :  { %812 = vperm.xlu1 %2318, %v412_v29   ;;  %807 = vperm.xlu0 %2317, %v411_v30  }
  0x81   :  { %v2744_v32 = vpop.permute.xlu1 %172  ;;  %v167_v33 = vpop.permute.xlu0 %166 }
  0x82   :  { %vm231_vm0 = vcmp.eq.s32.totalorder %v2746_v34, %v2744_v32  ;;  %vm229_vm4 = vcmp.eq.s32.totalorder %v2746_v34, %v167_v33 }
  0x83   :  { %v261_v52 = vsel %vm229_vm4, 1.0, %v2424_v50  ;;  %v263_v59 = vsel %vm231_vm0, 1.0, %v2424_v50 }
  0x85   :  { %v176_v35 = vpop.permute.xlu1 %175  ;;  %v170_v36 = vpop.permute.xlu0 %169 }
  0x86   :  { %vm232_vm1 = vcmp.eq.s32.totalorder %v2746_v34, %v176_v35  ;;  %vm230_vm2 = vcmp.eq.s32.totalorder %v2746_v34, %v170_v36 }
  0x87   :  { %vm1900_vm3 = vmpackc.low %vm232_vm1, %vm231_vm0  ;;  %v262_v51 = vsel %vm230_vm2, 1.0, %v2424_v50  ;;  %v264_v57 = vsel %vm232_vm1, 1.0, %v2424_v50 }
  0x88   :  { %vm1898_vm5 = vmpackc.low %vm230_vm2, %vm229_vm4  ;;  %v285_v56 = vpack.c.bf16 %v262_v51, %v261_v52  ;;  %v286_v62 = vpack.c.bf16 %v264_v57, %v263_v59 }
  0x89   :  { %2151 = vmatprep.mubr.msk.bf16.mxu1 %vm1898_vm5, %v2423_v38  ;;  %v182_v39 = vpop.permute.xlu1 %181  ;;  %v179_v40 = vpop.permute.xlu0 %178 }
  0x8a   :  { %vm234_vm6 = vcmp.eq.s32.totalorder %v2746_v34, %v182_v39  ;;  %vm233_vm7 = vcmp.eq.s32.totalorder %v2746_v34, %v179_v40  ;;  %2152 = vmatmul.mubr.msk.bf16.vlgmr.msra.gmra.mrb[0].mxu1 %vm1900_vm3, %v2423_v38 }
  0x8b   :  { %vm1902_vm8 = vmpackc.low %vm234_vm6, %vm233_vm7  ;;  %2168 = vmatpush3.bf16.msra.mxu1 %v2627_v55  ;;  %v2324_v55 = vld [vmem:[%s3472_s4 + $0x28] sm:$0xff]   ;;  %v266_v63 = vsel %vm234_vm6, 1.0, %v2424_v50  ;;  %v265_v0 = vsel %vm233_vm7, 1.0, %v2424_v50 }
  0x8c   :  { %2155 = vmatprep.mubr.msk.bf16.mxu1 %vm1902_vm8, %v2423_v38  ;;  %2169 = vmatprep.subr.bf16.mxu1 %v2320_v37  ;;  %v287_v4 = vpack.c.bf16 %v266_v63, %v265_v0 }
  0x8d   :  { %v188_v42 = vpop.permute.xlu1 %187  ;;  %v185_v43 = vpop.permute.xlu0 %184 }
  0x8e   :  { %vm236_vm9 = vcmp.eq.s32.totalorder %v2746_v34, %v188_v42  ;;  %vm235_vm10 = vcmp.eq.s32.totalorder %v2746_v34, %v185_v43 }
  0x8f   :  { %vm1904_vm11 = vmpackc.low %vm236_vm9, %vm235_vm10  ;;  %2170 = vmatpush3.bf16.msra.mxu1 %v2320_v37  ;;  %v268_v5 = vsel %vm236_vm9, 1.0, %v2424_v50  ;;  %v267_v6 = vsel %vm235_vm10, 1.0, %v2424_v50 }
  0x90   :  { %2171 = vmatprep.subr.bf16.mxu1 %v2321_v41  ;;  %v288_v12 = vpack.c.bf16 %v268_v5, %v267_v6 }
  0x91   :  { %v2787_v45 = vpop.permute.xlu1 %193  ;;  %v2789_v46 = vpop.permute.xlu0 %190 }
  0x92   :  { %vm238_vm12 = vcmp.eq.s32.totalorder %v2746_v34, %v2787_v45  ;;  %vm237_vm13 = vcmp.eq.s32.totalorder %v2746_v34, %v2789_v46  ;;  %2156 = vmatmul.mubr.msk.bf16.gmra.mrb[4].mxu1 %vm1904_vm11, %v2423_v38 }
  0x93   :  { %vm1906_vm14 = vmpackc.low %vm238_vm12, %vm237_vm13  ;;  %2172 = vmatpush3.bf16.msra.mxu1 %v2321_v41  ;;  %v270_v13 = vsel %vm238_vm12, 1.0, %v2424_v50  ;;  %v269_v14 = vsel %vm237_vm13, 1.0, %v2424_v50 }
  0x94   :  { %2159 = vmatprep.mubr.msk.bf16.mxu1 %vm1906_vm14, %v2423_v38  ;;  %2173 = vmatprep.subr.bf16.mxu1 %v2322_v44  ;;  %v289_v17 = vpack.c.bf16 %v270_v13, %v269_v14  ;;  %v2327_v14 = vld [vmem:[%s3473_s5] sm:$0xff]  }
  0x95   :  { %v2806_v48 = vpop.permute.xlu1 %199  ;;  %v2808_v49 = vpop.permute.xlu0 %196 }
  0x96   :  { %vm240_vm15 = vcmp.eq.s32.totalorder %v2746_v34, %v2806_v48  ;;  %vm239_vm3 = vcmp.eq.s32.totalorder %v2746_v34, %v2808_v49 }
  0x97   :  { %vm1908_vm5 = vmpackc.low %vm240_vm15, %vm239_vm3  ;;  %2174 = vmatpush3.bf16.msra.mxu1 %v2322_v44  ;;  %v272_v18 = vsel %vm240_vm15, 1.0, %v2424_v50  ;;  %v271_v19 = vsel %vm239_vm3, 1.0, %v2424_v50 }
  0x98   :  { %2175 = vmatprep.subr.bf16.mxu1 %v2323_v47  ;;  %v290_v26 = vpack.c.bf16 %v272_v18, %v271_v19  ;;  %v2332_v18 = vld [vmem:[%s3474_s6 + $0x10] sm:$0xff]   ;;  %v2333_v19 = vld [vmem:[%s3473_s5 + $0x18] sm:$0xff]  }
  0x99   :  { %v2826_v53 = vpop.permute.xlu1 %205  ;;  %v2828_v54 = vpop.permute.xlu0 %202 }
  0x9a   :  { %vm242_vm2 = vcmp.eq.s32.totalorder %v2746_v34, %v2826_v53  ;;  %vm241_vm8 = vcmp.eq.s32.totalorder %v2746_v34, %v2828_v54  ;;  %2160 = vmatmul.mubr.msk.bf16.gmra.mrb[8].mxu1 %vm1908_vm5, %v2423_v38 }
  0x9b   :  { %vm1910_vm4 = vmpackc.low %vm242_vm2, %vm241_vm8  ;;  %2176 = vmatpush3.bf16.msra.mxu1 %v2323_v47  ;;  %v274_v27 = vsel %vm242_vm2, 1.0, %v2424_v50  ;;  %v273_v28 = vsel %vm241_vm8, 1.0, %v2424_v50 }
  0x9c   :  { %1425 = vxpose.xlu0.c.b16.start [1/8] %v285_v56, 128  ;;  %2163 = vmatprep.mubr.msk.bf16.mxu1 %vm1910_vm4, %v2423_v38  ;;  %v291_v31 = vpack.c.bf16 %v274_v27, %v273_v28  ;;  %v2340_v27 = vld [vmem:[%s3474_s6 + $0x30] sm:$0xff]   ;;  %v2341_v28 = vld [vmem:[%s3473_s5 + $0x38] sm:$0xff]  }
  0x9d   :  { %v2855_v60 = vpop.permute.xlu1 %211  ;;  %v2857_v61 = vpop.permute.xlu0 %208  ;;  %2177 = vmatprep.subr.bf16.mxu1 %v2324_v55 }
  0x9e   :  { %vm244_vm1 = vcmp.eq.s32.totalorder %v2746_v34, %v2855_v60  ;;  %vm243_vm11 = vcmp.eq.s32.totalorder %v2746_v34, %v2857_v61 }
  0x9f   :  { %vm1912_vm0 = vmpackc.low %vm244_vm1, %vm243_vm11  ;;  %2178 = vmatpush3.bf16.msra.mxu1 %v2324_v55  ;;  %v276_v32 = vsel %vm244_vm1, 1.0, %v2424_v50  ;;  %v275_v33 = vsel %vm243_vm11, 1.0, %v2424_v50 }
  0xa0   :  { %1426 = vxpose.xlu0.c.b16.cont [2/8] %v286_v62, 128  ;;  %2179 = vmatprep.subr.bf16.mxu1 %v2325_v58  ;;  %v292_v41 = vpack.c.bf16 %v276_v32, %v275_v33 }
  0xa1   :  { %v122_v1 = vpop.permute.xlu1 %121  ;;  %v119_v2 = vpop.permute.xlu0 %118 }
  0xa2   :  { %vm214_vm6 = vcmp.eq.s32.totalorder %v2746_v34, %v122_v1  ;;  %vm213_vm7 = vcmp.eq.s32.totalorder %v2746_v34, %v119_v2  ;;  %2164 = vmatmul.mubr.msk.bf16.gmra.mrb[12].mxu1 %vm1912_vm0, %v2423_v38 }
  0xa3   :  { %v246_v7 = vsel %vm214_vm6, 1.0, %v2424_v50  ;;  %v245_v8 = vsel %vm213_vm7, 1.0, %v2424_v50  ;;  %vm1882_vm14 = vmpackc.low %vm214_vm6, %vm213_vm7  ;;  %2180 = vmatpush3.bf16.msra.mxu1 %v2325_v58 }
  0xa4   :  { %v277_v9 = vpack.c.bf16 %v246_v7, %v245_v8  ;;  %1427 = vxpose.xlu0.c.b16.cont [3/8] %v287_v4, 128  ;;  %2135 = vmatprep.mubr.msk.bf16.mxu0 %vm1882_vm14, %v2423_v38 }
  0xa5   :  { %v314_v10 = vpop.permute.xlu1 %313  ;;  %v311_v11 = vpop.permute.xlu0 %310  ;;  %2181 = vmatprep.subr.bf16.mxu1 %v2326_v3 }
  0xa6   :  { %vm358_vm9 = vcmp.eq.s32.totalorder %v2746_v34, %v314_v10  ;;  %vm357_vm5 = vcmp.eq.s32.totalorder %v2746_v34, %v311_v11  ;;  %1409 = vxpose.xlu1.c.b16.start [1/8] %v277_v9, 128 }
  0xa7   :  { %vm1922_vm10 = vmpackc.low %vm358_vm9, %vm357_vm5  ;;  %2182 = vmatpush3.bf16.msra.mxu1 %v2326_v3 }
  0xa8   :  { %1428 = vxpose.xlu0.c.b16.cont [4/8] %v288_v12, 128  ;;  %2183 = vmatprep.mubr.msk.bf16.mxu1 %vm1922_vm10, %v2423_v38 }
  0xa9   :  { %v128_v15 = vpop.permute.xlu1 %127  ;;  %v125_v16 = vpop.permute.xlu0 %124  ;;  %2199 = vmatprep.subr.bf16.mxu1 %v2327_v14 }
  0xaa   :  { %vm216_vm4 = vcmp.eq.s32.totalorder %v2746_v34, %v128_v15  ;;  %vm215_vm0 = vcmp.eq.s32.totalorder %v2746_v34, %v125_v16  ;;  %v2328_v15 = vld [vmem:[%s3474_s6] sm:$0xff]   ;;  %v2329_v16 = vld [vmem:[%s3473_s5 + $0x8] sm:$0xff]  }
  0xab   :  { %v248_v20 = vsel %vm216_vm4, 1.0, %v2424_v50  ;;  %v247_v21 = vsel %vm215_vm0, 1.0, %v2424_v50  ;;  %vm1884_vm12 = vmpackc.low %vm216_vm4, %vm215_vm0  ;;  %2231 = vmatprep.subr.bf16.mxu0 %v2328_v15 }
  0xac   :  { %v278_v22 = vpack.c.bf16 %v248_v20, %v247_v21  ;;  %1429 = vxpose.xlu0.c.b16.cont [5/8] %v289_v17, 128  ;;  %2136 = vmatmul.mubr.msk.bf16.vlgmr.msra.gmra.mrb[0].mxu0 %vm1884_vm12, %v2423_v38  ;;  %v2331_v17 = vld [vmem:[%s3473_s5 + $0x10] sm:$0xff]   ;;  %v2334_v20 = vld [vmem:[%s3474_s6 + $0x18] sm:$0xff]   ;;  %v2335_v21 = vld [vmem:[%s3473_s5 + $0x20] sm:$0xff]  }
  0xad   :  { %v320_v23 = vpop.permute.xlu1 %319  ;;  %v317_v25 = vpop.permute.xlu0 %316  ;;  %2232 = vmatpush3.bf16.msra.mxu0 %v2328_v15 }
  0xae   :  { %vm360_vm13 = vcmp.eq.s32.totalorder %v2746_v34, %v320_v23  ;;  %vm359_vm15 = vcmp.eq.s32.totalorder %v2746_v34, %v317_v25  ;;  %1410 = vxpose.xlu1.c.b16.cont [2/8] %v278_v22, 128  ;;  %v2336_v22 = vld [vmem:[%s3474_s6 + $0x20] sm:$0xff]   ;;  %v2337_v23 = vld [vmem:[%s3473_s5 + $0x28] sm:$0xff]  }
  0xaf   :  { %vm1924_vm3 = vmpackc.low %vm360_vm13, %vm359_vm15  ;;  %v2338_v25 = vld [vmem:[%s3474_s6 + $0x28] sm:$0xff]  }
  0xb0   :  { %1430 = vxpose.xlu0.c.b16.cont [6/8] %v290_v26, 128  ;;  %2184 = vmatmul.mubr.msk.bf16.vlgmr.msra.gmra.mrb[16].mxu1 %vm1924_vm3, %v2423_v38  ;;  %v2339_v26 = vld [vmem:[%s3473_s5 + $0x30] sm:$0xff]  }
  0xb1   :  { %v134_v29 = vpop.permute.xlu1 %133  ;;  %v131_v30 = vpop.permute.xlu0 %130  ;;  %2200 = vmatpush3.bf16.msra.mxu1 %v2327_v14 }
  0xb2   :  { %vm218_vm6 = vcmp.eq.s32.totalorder %v2746_v34, %v134_v29  ;;  %vm217_vm7 = vcmp.eq.s32.totalorder %v2746_v34, %v131_v30  ;;  %2201 = vmatprep.subr.bf16.mxu1 %v2329_v16  ;;  %v2342_v29 = vld [vmem:[%s3474_s6 + $0x38] sm:$0xff]  }
  0xb3   :  { %v250_v35 = vsel %vm218_vm6, 1.0, %v2424_v50  ;;  %v249_v36 = vsel %vm217_vm7, 1.0, %v2424_v50  ;;  %vm1886_vm2 = vmpackc.low %vm218_vm6, %vm217_vm7 }
  0xb4   :  { %v279_v37 = vpack.c.bf16 %v250_v35, %v249_v36  ;;  %1431 = vxpose.xlu0.c.b16.cont [7/8] %v291_v31, 128  ;;  %2139 = vmatprep.mubr.msk.bf16.mxu0 %vm1886_vm2, %v2423_v38 }
  0xb5   :  { %v326_v39 = vpop.permute.xlu1 %325  ;;  %v323_v40 = vpop.permute.xlu0 %322  ;;  %2202 = vmatpush3.bf16.msra.mxu1 %v2329_v16 }
  0xb6   :  { %vm362_vm8 = vcmp.eq.s32.totalorder %v2746_v34, %v326_v39  ;;  %vm361_vm1 = vcmp.eq.s32.totalorder %v2746_v34, %v323_v40  ;;  %1411 = vxpose.xlu1.c.b16.cont [3/8] %v279_v37, 128  ;;  %2203 = vmatprep.subr.bf16.mxu1 %v2331_v17 }
  0xb7   :  { %vm1926_vm14 = vmpackc.low %vm362_vm8, %vm361_vm1 }
  0xb8   :  { %1432 = vxpose.xlu0.c.b16.end [8/8] %v292_v41, 128  ;;  %2187 = vmatprep.mubr.msk.bf16.mxu1 %vm1926_vm14, %v2423_v38 }
  0xb9   :  { %v140_v42 = vpop.permute.xlu1 %139  ;;  %v137_v43 = vpop.permute.xlu0 %136  ;;  %2204 = vmatpush3.bf16.msra.mxu1 %v2331_v17 }
  0xba   :  { %vm220_vm11 = vcmp.eq.s32.totalorder %v2746_v34, %v140_v42  ;;  %vm219_vm9 = vcmp.eq.s32.totalorder %v2746_v34, %v137_v43  ;;  %2205 = vmatprep.subr.bf16.mxu1 %v2333_v19 }
  0xbb   :  { %v252_v44 = vsel %vm220_vm11, 1.0, %v2424_v50  ;;  %v251_v45 = vsel %vm219_vm9, 1.0, %v2424_v50  ;;  %vm1888_vm5 = vmpackc.low %vm220_vm11, %vm219_vm9 }
  0xbc   :  { %v280_v46 = vpack.c.bf16 %v252_v44, %v251_v45  ;;  %2140 = vmatmul.mubr.msk.bf16.gmra.mrb[4].mxu0 %vm1888_vm5, %v2423_v38 }
  0xbd   :  { %v332_v47 = vpop.permute.xlu1 %331  ;;  %v329_v48 = vpop.permute.xlu0 %328  ;;  %2206 = vmatpush3.bf16.msra.mxu1 %v2333_v19 }
  0xbe   :  { %vm364_vm10 = vcmp.eq.s32.totalorder %v2746_v34, %v332_v47  ;;  %vm363_vm4 = vcmp.eq.s32.totalorder %v2746_v34, %v329_v48  ;;  %1412 = vxpose.xlu1.c.b16.cont [4/8] %v280_v46, 128  ;;  %2207 = vmatprep.subr.bf16.mxu1 %v2335_v21 }
  0xbf   :  { %vm1928_vm0 = vmpackc.low %vm364_vm10, %vm363_vm4 }
  0xc0   :  { %2188 = vmatmul.mubr.msk.bf16.gmra.mrb[20].mxu1 %vm1928_vm0, %v2423_v38 }
  0xc1   :  { %v146_v49 = vpop.permute.xlu1 %145  ;;  %v143_v51 = vpop.permute.xlu0 %142  ;;  %2208 = vmatpush3.bf16.msra.mxu1 %v2335_v21 }
  0xc2   :  { %vm222_vm12 = vcmp.eq.s32.totalorder %v2746_v34, %v146_v49  ;;  %vm221_vm13 = vcmp.eq.s32.totalorder %v2746_v34, %v143_v51  ;;  %2209 = vmatprep.subr.bf16.mxu1 %v2337_v23 }
  0xc3   :  { %v254_v52 = vsel %vm222_vm12, 1.0, %v2424_v50  ;;  %v253_v53 = vsel %vm221_vm13, 1.0, %v2424_v50  ;;  %vm1890_vm15 = vmpackc.low %vm222_vm12, %vm221_vm13 }
  0xc4   :  { %v281_v54 = vpack.c.bf16 %v254_v52, %v253_v53  ;;  %2143 = vmatprep.mubr.msk.bf16.mxu0 %vm1890_vm15, %v2423_v38 }
  0xc5   :  { %v338_v55 = vpop.permute.xlu1 %337  ;;  %v335_v56 = vpop.permute.xlu0 %334  ;;  %2210 = vmatpush3.bf16.msra.mxu1 %v2337_v23 }
  0xc6   :  { %vm366_vm3 = vcmp.eq.s32.totalorder %v2746_v34, %v338_v55  ;;  %vm365_vm6 = vcmp.eq.s32.totalorder %v2746_v34, %v335_v56  ;;  %1413 = vxpose.xlu1.c.b16.cont [5/8] %v281_v54, 128  ;;  %2211 = vmatprep.subr.bf16.mxu1 %v2339_v26 }
  0xc7   :  { %vm1930_vm7 = vmpackc.low %vm366_vm3, %vm365_vm6 }
  0xc8   :  { %2191 = vmatprep.mubr.msk.bf16.mxu1 %vm1930_vm7, %v2423_v38 }
  0xc9   :  { %v152_v57 = vpop.permute.xlu1 %151  ;;  %v149_v58 = vpop.permute.xlu0 %148  ;;  %2212 = vmatpush3.bf16.msra.mxu1 %v2339_v26 }
  0xca   :  { %vm224_vm2 = vcmp.eq.s32.totalorder %v2746_v34, %v152_v57  ;;  %vm223_vm8 = vcmp.eq.s32.totalorder %v2746_v34, %v149_v58  ;;  %2213 = vmatprep.subr.bf16.mxu1 %v2341_v28 }
  0xcb   :  { %v256_v59 = vsel %vm224_vm2, 1.0, %v2424_v50  ;;  %v255_v60 = vsel %vm223_vm8, 1.0, %v2424_v50  ;;  %vm1892_vm1 = vmpackc.low %vm224_vm2, %vm223_vm8 }
  0xcc   :  { %v282_v61 = vpack.c.bf16 %v256_v59, %v255_v60  ;;  %2144 = vmatmul.mubr.msk.bf16.gmra.mrb[8].mxu0 %vm1892_vm1, %v2423_v38  ;;  %vm1593_vm1 = vcmp.lt.s32.totalorder %v2746_v34, 32 }
  0xcd   :  { %v344_v62 = vpop.permute.xlu1 %343  ;;  %v341_v63 = vpop.permute.xlu0 %340  ;;  %2214 = vmatpush3.bf16.msra.mxu1 %v2341_v28 }
  0xce   :  { %vm368_vm14 = vcmp.eq.s32.totalorder %v2746_v34, %v344_v62  ;;  %vm367_vm11 = vcmp.eq.s32.totalorder %v2746_v34, %v341_v63  ;;  %1414 = vxpose.xlu1.c.b16.cont [6/8] %v282_v61, 128 }
  0xcf   :  { %vm1932_vm9 = vmpackc.low %vm368_vm14, %vm367_vm11 }
  0xd0   :  { %2192 = vmatmul.mubr.msk.bf16.gmra.mrb[24].mxu1 %vm1932_vm9, %v2423_v38 }
  0xd1   :  { %v158_v0 = vpop.permute.xlu1 %157  ;;  %v155_v1 = vpop.permute.xlu0 %154 }
  0xd2   :  { %vm226_vm5 = vcmp.eq.s32.totalorder %v2746_v34, %v158_v0  ;;  %vm225_vm10 = vcmp.eq.s32.totalorder %v2746_v34, %v155_v1 }
  0xd3   :  { %v258_v2 = vsel %vm226_vm5, 1.0, %v2424_v50  ;;  %v257_v3 = vsel %vm225_vm10, 1.0, %v2424_v50  ;;  %vm1894_vm4 = vmpackc.low %vm226_vm5, %vm225_vm10 }
  0xd4   :  { %v283_v4 = vpack.c.bf16 %v258_v2, %v257_v3  ;;  %2147 = vmatprep.mubr.msk.bf16.mxu0 %vm1894_vm4, %v2423_v38 }
  0xd5   :  { %v350_v5 = vpop.permute.xlu1 %349  ;;  %v347_v6 = vpop.permute.xlu0 %346 }
  0xd6   :  { %vm370_vm0 = vcmp.eq.s32.totalorder %v2746_v34, %v350_v5  ;;  %vm369_vm12 = vcmp.eq.s32.totalorder %v2746_v34, %v347_v6  ;;  %1415 = vxpose.xlu1.c.b16.cont [7/8] %v283_v4, 128 }
  0xd7   :  { %vm1934_vm13 = vmpackc.low %vm370_vm0, %vm369_vm12 }
  0xd8   :  { %2195 = vmatprep.mubr.msk.bf16.mxu1 %vm1934_vm13, %v2423_v38 }
  0xd9   :  { %v164_v7 = vpop.permute.xlu1 %163  ;;  %v161_v8 = vpop.permute.xlu0 %160 }
  0xda   :  { %vm228_vm15 = vcmp.eq.s32.totalorder %v2746_v34, %v164_v7  ;;  %vm227_vm3 = vcmp.eq.s32.totalorder %v2746_v34, %v161_v8 }
  0xdb   :  { %v260_v9 = vsel %vm228_vm15, 1.0, %v2424_v50  ;;  %v259_v10 = vsel %vm227_vm3, 1.0, %v2424_v50  ;;  %vm1896_vm6 = vmpackc.low %vm228_vm15, %vm227_vm3 }
  0xdc   :  { %v284_v11 = vpack.c.bf16 %v260_v9, %v259_v10  ;;  %2148 = vmatmul.mubr.msk.bf16.gmra.mrb[12].mxu0 %vm1896_vm6, %v2423_v38 }
  0xdd   :  { %v356_v12 = vpop.permute.xlu1 %355  ;;  %v353_v13 = vpop.permute.xlu0 %352 }
  0xde   :  { %vm372_vm7 = vcmp.eq.s32.totalorder %v2746_v34, %v356_v12  ;;  %vm371_vm2 = vcmp.eq.s32.totalorder %v2746_v34, %v353_v13  ;;  %1416 = vxpose.xlu1.c.b16.end [8/8] %v284_v11, 128 }
  0xdf   :  { %vm1936_vm8 = vmpackc.low %vm372_vm7, %vm371_vm2 }
  0xe0   :  { %2196 = vmatmul.mubr.msk.bf16.gmra.mrb[28].mxu1 %vm1936_vm8, %v2423_v38  ;;  %v2330_v38 = vld [vmem:[%s3474_s6 + $0x8] sm:$0xff]  }
  0xe1   :  { %2233 = vmatprep.subr.bf16.mxu0 %v2330_v38  ;;  %v743_v49 = vpop.permute.xlu1 %742  ;;  %v738_v52 = vpop.permute.xlu0 %737 }
  0xe2   :  { %2234 = vmatpush3.bf16.msra.mxu0 %v2330_v38 }
  0xe3   :  { %2235 = vmatprep.subr.bf16.mxu0 %v2332_v18 }
  0xe5   :  { %v753_v1 = vpop.permute.xlu1 %752  ;;  %v748_v2 = vpop.permute.xlu0 %747 }
  0xe6   :  { %2236 = vmatpush3.bf16.msra.mxu0 %v2332_v18 }
  0xe7   :  { %2237 = vmatprep.subr.bf16.mxu0 %v2334_v20 }
  0xe9   :  { %v763_v17 = vpop.permute.xlu1 %762  ;;  %v758_v19 = vpop.permute.xlu0 %757 }
  0xea   :  { %2238 = vmatpush3.bf16.msra.mxu0 %v2334_v20 }
  0xeb   :  { %2239 = vmatprep.subr.bf16.mxu0 %v2336_v22 }
  0xee   :  { %2240 = vmatpush3.bf16.msra.mxu0 %v2336_v22 }
  0xef   :  { %2241 = vmatprep.subr.bf16.mxu0 %v2338_v25 }
  0xf2   :  { %2242 = vmatpush3.bf16.msra.mxu0 %v2338_v25 }
  0xf3   :  { %2243 = vmatprep.subr.bf16.mxu0 %v2340_v27 }
  0xf6   :  { %2244 = vmatpush3.bf16.msra.mxu0 %v2340_v27 }
  0xf7   :  { %2245 = vmatprep.subr.bf16.mxu0 %v2342_v29 }
  0xfa   :  { %2246 = vmatpush3.bf16.msra.mxu0 %v2342_v29 }
 0x15d   :  { %v2153_v30 = vpop.f32.mrb[0].mxu1 }
 0x15e   :  { %v511_v31 = vpop.f32.mrb[1].mxu1 }
 0x15f   :  { %v2154_v32 = vpop.f32.mrb[2].mxu1 }
 0x160   :  { %v514_v33 = vpop.f32.mrb[3].mxu1 }
 0x165   :  { %v3029_v35 = vpop.f32.mrb[4].mxu1 }
 0x166   :  { %v3031_v36 = vpop.f32.mrb[5].mxu1 }
 0x167   :  { %v3033_v37 = vpop.f32.mrb[6].mxu1 }
 0x168   :  { %v3035_v39 = vpop.f32.mrb[7].mxu1 }
 0x16d   :  { %v3037_v40 = vpop.f32.mrb[8].mxu1 }
 0x16e   :  { %v3039_v41 = vpop.f32.mrb[9].mxu1 }
 0x16f   :  { %v3041_v42 = vpop.f32.mrb[10].mxu1 }
 0x170   :  { %v3043_v43 = vpop.f32.mrb[11].mxu1 }
 0x175   :  { %v3045_v44 = vpop.f32.mrb[12].mxu1 }
 0x176   :  { %v3047_v45 = vpop.f32.mrb[13].mxu1 }
 0x177   :  { %v3049_v46 = vpop.f32.mrb[14].mxu1 }
 0x178   :  { %v3051_v47 = vpop.f32.mrb[15].mxu1 }
 0x17f   :  { %v2137_v48 = vpop.f32.mrb[0].mxu0 }
 0x180   :  { %v447_v51 = vpop.f32.mrb[1].mxu0 }
 0x181   :  { %v2138_v53 = vpop.f32.mrb[2].mxu0 }
 0x182   :  { %v450_v54 = vpop.f32.mrb[3].mxu0 }
 0x183   :  { %v2185_v55 = vpop.f32.mrb[16].mxu1 }
 0x184   :  { %v721_v56 = vsub.f32 %v2137_v48, %v2185_v55  ;;  %v833_v57 = vsub.f32 %v2153_v30, %v2185_v55  ;;  %v656_v58 = vpop.f32.mrb[17].mxu1  ;;  %v768_v48 = vpop.permute.xlu0 %767 }
 0x185   :  { %v719_v59 = vsub.f32 %v447_v51, %v656_v58  ;;  %v831_v60 = vsub.f32 %v511_v31, %v656_v58  ;;  %v2186_v61 = vpop.f32.mrb[18].mxu1 }
 0x186   :  { %v722_v62 = vsub.f32 %v2138_v53, %v2186_v61  ;;  %v834_v63 = vsub.f32 %v2154_v32, %v2186_v61  ;;  %v659_v0 = vpop.f32.mrb[19].mxu1  ;;  %v817_v5 = vmul.f32 %v748_v2, %v721_v56  ;;  %v849_v6 = vmul.f32 %v833_v57, %v748_v2 }
 0x187   :  { %v720_v3 = vsub.f32 %v450_v54, %v659_v0  ;;  %v832_v4 = vsub.f32 %v514_v33, %v659_v0  ;;  %v815_v9 = vmul.f32 %v738_v52, %v719_v59  ;;  %v847_v10 = vmul.f32 %v831_v60, %v738_v52  ;;  %v773_v33 = vpop.permute.xlu1 %772 }
 0x188   :  { %v818_v7 = vmul.f32 %v753_v1, %v722_v62  ;;  %v850_v8 = vmul.f32 %v834_v63, %v753_v1 }
 0x189   :  { %v816_v11 = vmul.f32 %v743_v49, %v720_v3  ;;  %v848_v12 = vmul.f32 %v832_v4, %v743_v49 }
 0x18a   :  { %v864_v13 = vpack.c.bf16 %v818_v7, %v817_v5  ;;  %v1033_v14 = vpack.c.bf16 %v850_v8, %v849_v6 }
 0x18b   :  { %v863_v15 = vpack.c.bf16 %v816_v11, %v815_v9  ;;  %v1032_v16 = vpack.c.bf16 %v848_v12, %v847_v10  ;;  %v783_v62 = vpop.permute.xlu1 %782 }
 0x18d   :  { %2215 = vmatprep.mubr.bf16.mxu1 %v863_v15  ;;  %2247 = vmatprep.mubr.bf16.mxu0 %v1032_v16 }
 0x18e   :  { %2216 = vmatmul.mubr.bf16.vlgmr.msra.gmra.mrb[32].mxu1 %v864_v13  ;;  %2248 = vmatmul.mubr.bf16.vlgmr.msra.gmra.mrb[16].mxu0 %v1033_v14 }
 0x18f   :  { %v2141_v38 = vpop.f32.mrb[4].mxu0  ;;  %v793_v12 = vpop.permute.xlu1 %792 }
 0x190   :  { %v463_v18 = vpop.f32.mrb[5].mxu0 }
 0x191   :  { %v2142_v20 = vpop.f32.mrb[6].mxu0 }
 0x192   :  { %v466_v21 = vpop.f32.mrb[7].mxu0 }
 0x193   :  { %v2189_v22 = vpop.f32.mrb[20].mxu1 }
 0x194   :  { %v725_v23 = vsub.f32 %v2141_v38, %v2189_v22  ;;  %v837_v25 = vsub.f32 %v3029_v35, %v2189_v22  ;;  %v672_v26 = vpop.f32.mrb[21].mxu1 }
 0x195   :  { %v723_v27 = vsub.f32 %v463_v18, %v672_v26  ;;  %v835_v28 = vsub.f32 %v3031_v36, %v672_v26  ;;  %v2190_v29 = vpop.f32.mrb[22].mxu1  ;;  %v803_v26 = vpop.permute.xlu1 %802 }
 0x196   :  { %v726_v30 = vsub.f32 %v2142_v20, %v2190_v29  ;;  %v838_v31 = vsub.f32 %v3033_v37, %v2190_v29  ;;  %v675_v32 = vpop.f32.mrb[23].mxu1  ;;  %v821_v52 = vmul.f32 %v768_v48, %v725_v23  ;;  %v853_v53 = vmul.f32 %v837_v25, %v768_v48 }
 0x197   :  { %v724_v49 = vsub.f32 %v466_v21, %v675_v32  ;;  %v836_v51 = vsub.f32 %v3035_v39, %v675_v32  ;;  %v819_v56 = vmul.f32 %v758_v19, %v723_v27  ;;  %v851_v35 = vmul.f32 %v835_v28, %v758_v19  ;;  %v778_v39 = vpop.permute.xlu0 %777 }
 0x198   :  { %v822_v54 = vmul.f32 %v773_v33, %v726_v30  ;;  %v854_v55 = vmul.f32 %v838_v31, %v773_v33 }
 0x199   :  { %v820_v57 = vmul.f32 %v763_v17, %v724_v49  ;;  %v852_v58 = vmul.f32 %v836_v51, %v763_v17 }
 0x19a   :  { %v866_v59 = vpack.c.bf16 %v822_v54, %v821_v52  ;;  %v1035_v36 = vpack.c.bf16 %v854_v55, %v853_v53  ;;  %v813_v55 = vpop.permute.xlu1 %812 }
 0x19b   :  { %v865_v60 = vpack.c.bf16 %v820_v57, %v819_v56  ;;  %v1034_v61 = vpack.c.bf16 %v852_v58, %v851_v35  ;;  %v788_v13 = vpop.permute.xlu0 %787 }
 0x19d   :  { %2219 = vmatprep.mubr.bf16.mxu1 %v865_v60  ;;  %2251 = vmatprep.mubr.bf16.mxu0 %v1034_v61 }
 0x19e   :  { %2220 = vmatmul.mubr.bf16.gmra.mrb[36].mxu1 %v866_v59  ;;  %2252 = vmatmul.mubr.bf16.gmra.mrb[20].mxu0 %v1035_v36 }
 0x19f   :  { %v2145_v37 = vpop.f32.mrb[8].mxu0 }
 0x1a0   :  { %v479_v63 = vpop.f32.mrb[9].mxu0 }
 0x1a1   :  { %v2146_v0 = vpop.f32.mrb[10].mxu0 }
 0x1a2   :  { %v482_v1 = vpop.f32.mrb[11].mxu0 }
 0x1a3   :  { %v2193_v2 = vpop.f32.mrb[24].mxu1 }
 0x1a4   :  { %v729_v3 = vsub.f32 %v2145_v37, %v2193_v2  ;;  %v841_v4 = vsub.f32 %v3037_v40, %v2193_v2  ;;  %v688_v5 = vpop.f32.mrb[25].mxu1  ;;  %v2346_v2 = vld [vmem:[%s3475_s7 + $0x18] sm:$0xff]  }
 0x1a5   :  { %v727_v6 = vsub.f32 %v479_v63, %v688_v5  ;;  %v839_v7 = vsub.f32 %v3039_v41, %v688_v5  ;;  %v2194_v8 = vpop.f32.mrb[26].mxu1  ;;  %v2349_v5 = vld [vmem:[%s3475_s7 + $0x30] sm:$0xff]  }
 0x1a6   :  { %v730_v9 = vsub.f32 %v2146_v0, %v2194_v8  ;;  %v842_v10 = vsub.f32 %v3041_v42, %v2194_v8  ;;  %v691_v11 = vpop.f32.mrb[27].mxu1  ;;  %v825_v16 = vmul.f32 %v788_v13, %v729_v3  ;;  %v857_v38 = vmul.f32 %v841_v4, %v788_v13  ;;  %v2347_v3 = vld [vmem:[%s3475_s7 + $0x20] sm:$0xff]   ;;  %v2348_v4 = vld [vmem:[%s3475_s7 + $0x28] sm:$0xff]  }
 0x1a7   :  { %v728_v14 = vsub.f32 %v482_v1, %v691_v11  ;;  %v840_v15 = vsub.f32 %v3043_v43, %v691_v11  ;;  %v823_v19 = vmul.f32 %v778_v39, %v727_v6  ;;  %v855_v40 = vmul.f32 %v839_v7, %v778_v39  ;;  %v798_v43 = vpop.permute.xlu0 %797  ;;  %v2345_v1 = vld [vmem:[%s3475_s7 + $0x10] sm:$0xff]   ;;  %v2350_v7 = vld [vmem:[%s3475_s7 + $0x38] sm:$0xff]   ;;  %v2383_v8 = vld [vmem:[%s3471_s3] sm:$0xff] }
 0x1a8   :  { %v826_v17 = vmul.f32 %v793_v12, %v730_v9  ;;  %v858_v18 = vmul.f32 %v842_v10, %v793_v12  ;;  %v2384_v9 = vld [vmem:[%s3476_s8] ss:$0 sm:$0xff]  ;;  %v2385_v11 = vld [vmem:[%s3471_s3 + $0x8] sm:$0xff] }
 0x1a9   :  { %v824_v20 = vmul.f32 %v783_v62, %v728_v14  ;;  %v856_v21 = vmul.f32 %v840_v15, %v783_v62  ;;  %v1224_v10 = vsub.f32 %v2383_v8, %v2384_v9  ;;  %v1225_v12 = vsub.f32 %v2385_v11, %v2384_v9  ;;  %v2386_v14 = vld [vmem:[%s3471_s3 + $0x20] sm:$0xff] }
 0x1aa   :  { %v868_v22 = vpack.c.bf16 %v826_v17, %v825_v16  ;;  %v1037_v41 = vpack.c.bf16 %v858_v18, %v857_v38  ;;  %v1228_v15 = vsub.f32 %v2386_v14, %v2384_v9  ;;  %v2387_v16 = vld [vmem:[%s3471_s3 + $0x28] sm:$0xff]  ;;  %v2388_v17 = vld [vmem:[%s3471_s3 + $0x30] sm:$0xff] }
 0x1ab   :  { %v867_v23 = vpack.c.bf16 %v824_v20, %v823_v19  ;;  %v1036_v25 = vpack.c.bf16 %v856_v21, %v855_v40  ;;  %v808_v56 = vpop.permute.xlu0 %807  ;;  %v1240_v13 = vpack.c.bf16 %v1225_v12, %v1224_v10  ;;  %v1229_v38 = vsub.f32 %v2387_v16, %v2384_v9  ;;  %v2389_v19 = vld [vmem:[%s3471_s3 + $0x38] sm:$0xff]  ;;  %v2390_v21 = vld [vmem:[%s3471_s3 + $0x40] sm:$0xff] }
 0x1ac   :  { %v1230_v18 = vsub.f32 %v2388_v17, %v2384_v9 }
 0x1ad   :  { %2223 = vmatprep.mubr.bf16.mxu1 %v867_v23  ;;  %2255 = vmatprep.mubr.bf16.mxu0 %v1036_v25  ;;  %v1242_v40 = vpack.c.bf16 %v1229_v38, %v1228_v15  ;;  %v2392_v25 = vld [vmem:[%s3471_s3 + $0x50] sm:$0xff] }
 0x1ae   :  { %2224 = vmatmul.mubr.bf16.gmra.mrb[40].mxu1 %v868_v22  ;;  %2256 = vmatmul.mubr.bf16.gmra.mrb[24].mxu0 %v1037_v41  ;;  %v1232_v22 = vsub.f32 %v2390_v21, %v2384_v9  ;;  %v2391_v41 = vld [vmem:[%s3471_s3 + $0x48] sm:$0xff] }
 0x1af   :  { %v2149_v42 = vpop.f32.mrb[12].mxu0  ;;  %v1433_v6 = vpop.trf.xlu0  ;;  %v1233_v23 = vsub.f32 %v2391_v41, %v2384_v9 }
 0x1b0   :  { %v495_v27 = vpop.f32.mrb[13].mxu0 }
 0x1b1   :  { %v2150_v28 = vpop.f32.mrb[14].mxu0 }
 0x1b2   :  { %v498_v29 = vpop.f32.mrb[15].mxu0 }
 0x1b3   :  { %v2197_v30 = vpop.f32.mrb[28].mxu1 }
 0x1b4   :  { %v733_v31 = vsub.f32 %v2149_v42, %v2197_v30  ;;  %v845_v32 = vsub.f32 %v3045_v44, %v2197_v30  ;;  %v704_v33 = vpop.f32.mrb[29].mxu1  ;;  %v1234_v42 = vsub.f32 %v2392_v25, %v2384_v9 }
 0x1b5   :  { %v731_v48 = vsub.f32 %v495_v27, %v704_v33  ;;  %v843_v49 = vsub.f32 %v3047_v45, %v704_v33  ;;  %v2198_v51 = vpop.f32.mrb[30].mxu1  ;;  %v2396_v33 = vld [vmem:[%s3471_s3 + $0x70] sm:$0xff] }
 0x1b6   :  { %v734_v52 = vsub.f32 %v2150_v28, %v2198_v51  ;;  %v846_v53 = vsub.f32 %v3049_v46, %v2198_v51  ;;  %v707_v54 = vpop.f32.mrb[31].mxu1  ;;  %v829_v58 = vmul.f32 %v808_v56, %v733_v31  ;;  %v861_v59 = vmul.f32 %v845_v32, %v808_v56  ;;  %v2343_v46 = vld [vmem:[%s3475_s7] sm:$0xff]   ;;  %v2395_v31 = vld [vmem:[%s3471_s3 + $0x68] sm:$0xff] }
 0x1b7   :  { %v732_v35 = vsub.f32 %v498_v29, %v707_v54  ;;  %v844_v57 = vsub.f32 %v3051_v47, %v707_v54  ;;  %v827_v61 = vmul.f32 %v798_v43, %v731_v48  ;;  %v859_v44 = vmul.f32 %v843_v49, %v798_v43  ;;  %2263 = vmatprep.subr.bf16.mxu1 %v2343_v46  ;;  %v2344_v47 = vld [vmem:[%s3475_s7 + $0x8] sm:$0xff]   ;;  %v2394_v29 = vld [vmem:[%s3471_s3 + $0x60] sm:$0xff]  ;;  %v2397_v49 = vld [vmem:[%s3471_s3 + $0x78] sm:$0xff] }
 0x1b8   :  { %v830_v36 = vmul.f32 %v813_v55, %v734_v52  ;;  %v862_v60 = vmul.f32 %v846_v53, %v813_v55  ;;  %2264 = vmatpush3.bf16.msra.mxu1 %v2343_v46  ;;  %v1244_v43 = vpack.c.bf16 %v1233_v23, %v1232_v22  ;;  %v1236_v30 = vsub.f32 %v2394_v29, %v2384_v9 }
 0x1b9   :  { %v828_v37 = vmul.f32 %v803_v26, %v732_v35  ;;  %v860_v62 = vmul.f32 %v844_v57, %v803_v26  ;;  %2265 = vmatprep.subr.bf16.mxu1 %v2344_v47  ;;  %v2393_v26 = vld [vmem:[%s3471_s3 + $0x58] sm:$0xff]  ;;  %v1237_v32 = vsub.f32 %v2395_v31, %v2384_v9  ;;  %v1238_v48 = vsub.f32 %v2396_v33, %v2384_v9 }
 0x1ba   :  { %v870_v63 = vpack.c.bf16 %v830_v36, %v829_v58  ;;  %v1039_v45 = vpack.c.bf16 %v862_v60, %v861_v59  ;;  %v1235_v27 = vsub.f32 %v2393_v26, %v2384_v9  ;;  %v1239_v51 = vsub.f32 %v2397_v49, %v2384_v9  ;;  %v1417_v26 = vpop.trf.xlu1 }
 0x1bb   :  { %v869_v39 = vpack.c.bf16 %v828_v37, %v827_v61  ;;  %v1038_v0 = vpack.c.bf16 %v860_v62, %v859_v44  ;;  %v1246_v52 = vpack.c.bf16 %v1237_v32, %v1236_v30 }
 0x1bc   :  { %2266 = vmatpush3.bf16.msra.mxu1 %v2344_v47  ;;  %v1245_v28 = vpack.c.bf16 %v1235_v27, %v1234_v42  ;;  %v1247_v53 = vpack.c.bf16 %v1239_v51, %v1238_v48  ;;  %v1434_v27 = vpop.trf.xlu0 }
 0x1bd   :  { %2227 = vmatprep.mubr.bf16.mxu1 %v869_v39  ;;  %2259 = vmatprep.mubr.bf16.mxu0 %v1038_v0 }
 0x1be   :  { %2228 = vmatmul.mubr.bf16.gmra.mrb[44].mxu1 %v870_v63  ;;  %2260 = vmatmul.mubr.bf16.gmra.mrb[28].mxu0 %v1039_v45 }
 0x1bf   :  { %2267 = vmatprep.subr.bf16.mxu1 %v2345_v1  ;;  %1473 = vmatprep.mubr.bf16.mxu0 %v1433_v6 }
 0x1c0   :  { %2268 = vmatpush3.bf16.msra.mxu1 %v2345_v1  ;;  %2279 = vmatprep.mubr.bf16.mxu1 %v1240_v13 }
 0x1c1   :  { %2269 = vmatprep.subr.bf16.mxu1 %v2346_v2 }
 0x1c4   :  { %2270 = vmatpush3.bf16.msra.mxu1 %v2346_v2 }
 0x1c5   :  { %2271 = vmatprep.subr.bf16.mxu1 %v2347_v3 }
 0x1c8   :  { %2272 = vmatpush3.bf16.msra.mxu1 %v2347_v3 }
 0x1c9   :  { %2273 = vmatprep.subr.bf16.mxu1 %v2348_v4 }
 0x1cc   :  { %2274 = vmatpush3.bf16.msra.mxu1 %v2348_v4 }
 0x1cd   :  { %2275 = vmatprep.subr.bf16.mxu1 %v2349_v5 }
 0x1d0   :  { %2276 = vmatpush3.bf16.msra.mxu1 %v2349_v5 }
 0x1d1   :  { %2277 = vmatprep.subr.bf16.mxu1 %v2350_v7 }
 0x1d4   :  { %2278 = vmatpush3.bf16.msra.mxu1 %v2350_v7 }
 0x1d7   :  { %2280 = vmatmul.mubr.bf16.vlgmr.msra.gmra.mrb[48].mxu1 %v2550_v24  ;;  %v1231_v24 = vsub.f32 %v2389_v19, %v2384_v9 }
 0x1d8   :  { %2283 = vmatprep.mubr.bf16.mxu1 %v1242_v40 }
 0x1d9   :  { %v1243_v20 = vpack.c.bf16 %v1231_v24, %v1230_v18 }
 0x1df   :  { %2284 = vmatmul.mubr.bf16.gmra.mrb[52].mxu1 %v1243_v20 }
 0x1e0   :  { %2287 = vmatprep.mubr.bf16.mxu1 %v1244_v43  ;;  %v1418_v43 = vpop.trf.xlu1 }
 0x1e4   :  { %v1419_v29 = vpop.trf.xlu1 }
 0x1e7   :  { %2288 = vmatmul.mubr.bf16.gmra.mrb[56].mxu1 %v1245_v28  ;;  %v1435_v28 = vpop.trf.xlu0 }
 0x1e8   :  { %2291 = vmatprep.mubr.bf16.mxu1 %v1246_v52  ;;  %v1420_v31 = vpop.trf.xlu1 }
 0x1eb   :  { %v1436_v30 = vpop.trf.xlu0 }
 0x1ec   :  { %v1421_v33 = vpop.trf.xlu1 }
 0x1ef   :  { %2292 = vmatmul.mubr.bf16.gmra.mrb[60].mxu1 %v1247_v53  ;;  %v1437_v32 = vpop.trf.xlu0 }
 0x1f0   :  { %v1422_v49 = vpop.trf.xlu1 }
 0x1f3   :  { %v1438_v48 = vpop.trf.xlu0 }
 0x1f4   :  { %v1423_v52 = vpop.trf.xlu1 }
 0x1f7   :  { %v1439_v51 = vpop.trf.xlu0 }
 0x1fb   :  { %v1440_v53 = vpop.trf.xlu0 }
 0x261   :  { %v2217_v54 = vpop.f32.mrb[32].mxu1  ;;  %v2249_v55 = vpop.f32.mrb[16].mxu0 }
 0x262   :  { %v969_v56 = vpop.f32.mrb[33].mxu1  ;;  %v1138_v35 = vpop.f32.mrb[17].mxu0 }
 0x263   :  { %v2218_v57 = vpop.f32.mrb[34].mxu1  ;;  %v2250_v58 = vpop.f32.mrb[18].mxu0 }
 0x264   :  { %v1210_v59 = vpack.c.bf16 %v2218_v57, %v2217_v54  ;;  %v1202_v36 = vpack.c.bf16 %v2250_v58, %v2249_v55  ;;  %v972_v60 = vpop.f32.mrb[35].mxu1  ;;  %v1141_v61 = vpop.f32.mrb[19].mxu0 }
 0x265   :  { %v1209_v44 = vpack.c.bf16 %v972_v60, %v969_v56  ;;  %v1201_v37 = vpack.c.bf16 %v1141_v61, %v1138_v35  ;;  %v1424_v54 = vpop.trf.xlu1 }
 0x267   :  { %2055 = vmatprep.subr.bf16.mxu0 %v1209_v44 }
 0x268   :  { %2056 = vmatpush3.bf16.msra.mxu0 %v1201_v37 }
 0x269   :  { %2057 = vmatprep.subr.bf16.mxu0 %v1210_v59 }
 0x26c   :  { %2058 = vmatpush3.bf16.msra.mxu0 %v1202_v36 }
 0x271   :  { %v2221_v62 = vpop.f32.mrb[36].mxu1  ;;  %v2253_v63 = vpop.f32.mrb[20].mxu0 }
 0x272   :  { %v985_v45 = vpop.f32.mrb[37].mxu1  ;;  %v1154_v39 = vpop.f32.mrb[21].mxu0 }
 0x273   :  { %v2222_v0 = vpop.f32.mrb[38].mxu1  ;;  %v2254_v46 = vpop.f32.mrb[22].mxu0 }
 0x274   :  { %v1212_v47 = vpack.c.bf16 %v2222_v0, %v2221_v62  ;;  %v1204_v1 = vpack.c.bf16 %v2254_v46, %v2253_v63  ;;  %v988_v2 = vpop.f32.mrb[39].mxu1  ;;  %v1157_v3 = vpop.f32.mrb[23].mxu0 }
 0x275   :  { %v1211_v4 = vpack.c.bf16 %v988_v2, %v985_v45  ;;  %v1203_v5 = vpack.c.bf16 %v1157_v3, %v1154_v39 }
 0x277   :  { %2059 = vmatprep.subr.bf16.mxu0 %v1211_v4 }
 0x278   :  { %2060 = vmatpush3.bf16.msra.mxu0 %v1203_v5 }
 0x279   :  { %2061 = vmatprep.subr.bf16.mxu0 %v1212_v47 }
 0x27c   :  { %2062 = vmatpush3.bf16.msra.mxu0 %v1204_v1 }
 0x281   :  { %v2225_v6 = vpop.f32.mrb[40].mxu1  ;;  %v2257_v7 = vpop.f32.mrb[24].mxu0 }
 0x282   :  { %v1001_v8 = vpop.f32.mrb[41].mxu1  ;;  %v1170_v9 = vpop.f32.mrb[25].mxu0 }
 0x283   :  { %v2226_v10 = vpop.f32.mrb[42].mxu1  ;;  %v2258_v11 = vpop.f32.mrb[26].mxu0 }
 0x284   :  { %v1214_v12 = vpack.c.bf16 %v2226_v10, %v2225_v6  ;;  %v1206_v13 = vpack.c.bf16 %v2258_v11, %v2257_v7  ;;  %v1004_v14 = vpop.f32.mrb[43].mxu1  ;;  %v1173_v15 = vpop.f32.mrb[27].mxu0  ;;  %v3158_v6 = vld [vmem:[%s3477_s9] ss:$0 sm:$0xff] }
 0x285   :  { %v1213_v16 = vpack.c.bf16 %v1004_v14, %v1001_v8  ;;  %v1205_v38 = vpack.c.bf16 %v1173_v15, %v1170_v9 }
 0x287   :  { %2063 = vmatprep.subr.bf16.mxu0 %v1213_v16 }
 0x288   :  { %2064 = vmatpush3.bf16.msra.mxu0 %v1205_v38 }
 0x289   :  { %2065 = vmatprep.subr.bf16.mxu0 %v1214_v12 }
 0x28c   :  { %2066 = vmatpush3.bf16.msra.mxu0 %v1206_v13  ;;  %v3165_v13 = vsel %vm1593_vm1, 1.0, %v2424_v50 }
 0x291   :  { %v2229_v17 = vpop.f32.mrb[44].mxu1  ;;  %v2261_v18 = vpop.f32.mrb[28].mxu0 }
 0x292   :  { %v1017_v19 = vpop.f32.mrb[45].mxu1  ;;  %v1186_v24 = vpop.f32.mrb[29].mxu0 }
 0x293   :  { %v2230_v40 = vpop.f32.mrb[46].mxu1  ;;  %v2262_v20 = vpop.f32.mrb[30].mxu0 }
 0x294   :  { %v1216_v21 = vpack.c.bf16 %v2230_v40, %v2229_v17  ;;  %v1208_v22 = vpack.c.bf16 %v2262_v20, %v2261_v18  ;;  %v1020_v41 = vpop.f32.mrb[47].mxu1  ;;  %v1189_v23 = vpop.f32.mrb[31].mxu0 }
 0x295   :  { %v1215_v25 = vpack.c.bf16 %v1020_v41, %v1017_v19  ;;  %v1207_v42 = vpack.c.bf16 %v1189_v23, %v1186_v24 }
 0x297   :  { %2067 = vmatprep.subr.bf16.mxu0 %v1215_v25 }
 0x298   :  { %2068 = vmatpush3.bf16.msra.mxu0 %v1207_v42 }
 0x299   :  { %2069 = vmatprep.subr.bf16.mxu0 %v1216_v21 }
 0x29c   :  { %2070 = vmatpush3.bf16.msra.mxu0 %v1208_v22 }
 0x29f   :  { %1474 = vmatmul.mubr.bf16.vlgmr.msra.gmra.mrb[32].mxu0 %v1417_v26 }
 0x2a0   :  { %1481 = vmatprep.mubr.bf16.mxu0 %v1434_v27 }
 0x2a7   :  { %1482 = vmatmul.mubr.bf16.gmra.mrb[36].mxu0 %v1418_v43 }
 0x2a8   :  { %1489 = vmatprep.mubr.bf16.mxu0 %v1435_v28 }
 0x2aa   :  { %v2281_v55 = vpop.f32.mrb[48].mxu1 }
 0x2ab   :  { %v1346_v56 = vpop.f32.mrb[49].mxu1 }
 0x2ac   :  { %v2282_v35 = vpop.f32.mrb[50].mxu1 }
 0x2ad   :  { %v1349_v57 = vpop.f32.mrb[51].mxu1 }
 0x2af   :  { %1490 = vmatmul.mubr.bf16.gmra.mrb[40].mxu0 %v1419_v29 }
 0x2b0   :  { %1497 = vmatprep.mubr.bf16.mxu0 %v1436_v30 }
 0x2b2   :  { %v3135_v58 = vpop.f32.mrb[52].mxu1 }
 0x2b3   :  { %v1362_v59 = vpop.f32.mrb[53].mxu1 }
 0x2b4   :  { %v3137_v36 = vpop.f32.mrb[54].mxu1 }
 0x2b5   :  { %v1365_v60 = vpop.f32.mrb[55].mxu1 }
 0x2b7   :  { %1498 = vmatmul.mubr.bf16.gmra.mrb[44].mxu0 %v1420_v31 }
 0x2b8   :  { %1505 = vmatprep.mubr.bf16.mxu0 %v1437_v32 }
 0x2ba   :  { %v3139_v61 = vpop.f32.mrb[56].mxu1 }
 0x2bb   :  { %v3141_v44 = vpop.f32.mrb[57].mxu1 }
 0x2bc   :  { %v3143_v37 = vpop.f32.mrb[58].mxu1 }
 0x2bd   :  { %v3145_v62 = vpop.f32.mrb[59].mxu1 }
 0x2bf   :  { %1506 = vmatmul.mubr.bf16.gmra.mrb[48].mxu0 %v1421_v33 }
 0x2c0   :  { %1513 = vmatprep.mubr.bf16.mxu0 %v1438_v48 }
 0x2c2   :  { %v3147_v63 = vpop.f32.mrb[60].mxu1 }
 0x2c3   :  { %v3149_v45 = vpop.f32.mrb[61].mxu1 }
 0x2c4   :  { %v3151_v39 = vpop.f32.mrb[62].mxu1 }
 0x2c5   :  { %v3153_v0 = vpop.f32.mrb[63].mxu1 }
 0x2c7   :  { %1514 = vmatmul.mubr.bf16.gmra.mrb[52].mxu0 %v1422_v49 }
 0x2c8   :  { %1521 = vmatprep.mubr.bf16.mxu0 %v1439_v51 }
 0x2cf   :  { %1522 = vmatmul.mubr.bf16.gmra.mrb[56].mxu0 %v1423_v52 }
 0x2d0   :  { %1529 = vmatprep.mubr.bf16.mxu0 %v1440_v53 }
 0x2d7   :  { %1530 = vmatmul.mubr.bf16.gmra.mrb[60].mxu0 %v1424_v54 }
 0x372   :  { %v2071_v46 = vpop.f32.mrb[32].mxu0 }
 0x373   :  { %v2072_v47 = vpop.f32.mrb[33].mxu0 }
 0x374   :  { %v2073_v1 = vadd.f32 %v2072_v47, %v2071_v46  ;;  %v2074_v2 = vpop.f32.mrb[34].mxu0 }
 0x375   :  { %v2075_v3 = vpop.f32.mrb[35].mxu0 }
 0x376   :  { %v1476_v4 = vadd.f32 %v2073_v1, %v1346_v56  ;;  %v2076_v5 = vadd.f32 %v2075_v3, %v2074_v2 }
 0x378   :  { %v1538_v7 = vmul.f32 0.33333334, %v1476_v4  ;;  %v1479_v8 = vadd.f32 %v2076_v5, %v1349_v57 }
 0x37a   :  { %v3162_v9 = vadd.f32 %v3158_v6, %v1538_v7  ;;  %v1539_v10 = vmul.f32 0.33333334, %v1479_v8  ;;  %v2077_v11 = vpop.f32.mrb[36].mxu0 }
 0x37b   :  { %v2078_v12 = vpop.f32.mrb[37].mxu0 }
 0x37c   :  { %v3168_v14 = vadd.f32 %v3158_v6, %v1539_v10  ;;  %v2079_v15 = vadd.f32 %v2078_v12, %v2077_v11  ;;  %v2080_v16 = vpop.f32.mrb[38].mxu0  ;;  %v1577_v38 = vmax.f32 %v3162_v9, 0.0 }
 0x37d   :  { %v2081_v17 = vpop.f32.mrb[39].mxu0 }
 0x37e   :  { %v1484_v18 = vadd.f32 %v2281_v55, %v2079_v15  ;;  %v2082_v19 = vadd.f32 %v2081_v17, %v2080_v16  ;;  %v1596_v34 = vmul.f32 %v3165_v13, %v1577_v38  ;;  %v1578_v24 = vmax.f32 %v3168_v14, 0.0 }
 0x380   :  { %v1540_v40 = vmul.f32 0.33333334, %v1484_v18  ;;  %v1487_v20 = vadd.f32 %v2282_v35, %v2082_v19  ;;  %1612 = vadd.xlane.f32.xlu0 %v1596_v34  ;;  %v1597_v50 = vmul.f32 %v3165_v13, %v1578_v24 }
 0x382   :  { %v1541_v21 = vmul.f32 0.33333334, %v1487_v20  ;;  %v2083_v22 = vpop.f32.mrb[40].mxu0  ;;  %1614 = vadd.xlane.f32.xlu1 %v1597_v50  ;;  %v3179_v41 = vadd.f32 %v3158_v6, %v1540_v40 }
 0x383   :  { %v2084_v23 = vpop.f32.mrb[41].mxu0 }
 0x384   :  { %v2085_v25 = vadd.f32 %v2084_v23, %v2083_v22  ;;  %v2086_v42 = vpop.f32.mrb[42].mxu0  ;;  %v1579_v26 = vmax.f32 %v3179_v41, 0.0  ;;  %v3183_v27 = vadd.f32 %v3158_v6, %v1541_v21 }
 0x385   :  { %v2087_v43 = vpop.f32.mrb[43].mxu0 }
 0x386   :  { %v1492_v28 = vadd.f32 %v2085_v25, %v1362_v59  ;;  %v2088_v29 = vadd.f32 %v2087_v43, %v2086_v42  ;;  %v1598_v30 = vmul.f32 %v3165_v13, %v1579_v26  ;;  %v1580_v31 = vmax.f32 %v3183_v27, 0.0 }
 0x388   :  { %v1542_v32 = vmul.f32 0.33333334, %v1492_v28  ;;  %v1495_v33 = vadd.f32 %v2088_v29, %v1365_v60  ;;  %1616 = vadd.xlane.f32.xlu0 %v1598_v30  ;;  %v1599_v52 = vmul.f32 %v3165_v13, %v1580_v31 }
 0x38a   :  { %v3190_v48 = vadd.f32 %v3158_v6, %v1542_v32  ;;  %v1543_v49 = vmul.f32 0.33333334, %v1495_v33  ;;  %v2089_v51 = vpop.f32.mrb[44].mxu0 }
 0x38b   :  { %v2090_v53 = vpop.f32.mrb[45].mxu0 }
 0x38c   :  { %v3196_v54 = vadd.f32 %v3158_v6, %v1543_v49  ;;  %v2091_v55 = vadd.f32 %v2090_v53, %v2089_v51  ;;  %v2092_v56 = vpop.f32.mrb[46].mxu0  ;;  %1618 = vadd.xlane.f32.xlu0 %v1599_v52  ;;  %v1581_v35 = vmax.f32 %v3190_v48, 0.0 }
 0x38d   :  { %v2093_v57 = vpop.f32.mrb[47].mxu0 }
 0x38e   :  { %v1500_v59 = vadd.f32 %v3135_v58, %v2091_v55  ;;  %v2094_v60 = vadd.f32 %v2093_v57, %v2092_v56  ;;  %v1600_v46 = vmul.f32 %v3165_v13, %v1581_v35  ;;  %v1582_v47 = vmax.f32 %v3196_v54, 0.0 }
 0x390   :  { %v1544_v1 = vmul.f32 0.33333334, %v1500_v59  ;;  %v1503_v2 = vadd.f32 %v3137_v36, %v2094_v60  ;;  %1620 = vadd.xlane.f32.xlu1 %v1600_v46  ;;  %v1601_v3 = vmul.f32 %v3165_v13, %v1582_v47 }
 0x392   :  { %v1545_v4 = vmul.f32 0.33333334, %v1503_v2  ;;  %v2095_v5 = vpop.f32.mrb[48].mxu0  ;;  %1622 = vadd.xlane.f32.xlu0 %v1601_v3  ;;  %v3209_v58 = vadd.f32 %v3158_v6, %v1544_v1 }
 0x393   :  { %v2096_v7 = vpop.f32.mrb[49].mxu0 }
 0x394   :  { %v2097_v8 = vadd.f32 %v2096_v7, %v2095_v5  ;;  %v2098_v10 = vpop.f32.mrb[50].mxu0  ;;  %v1583_v11 = vmax.f32 %v3209_v58, 0.0  ;;  %v3213_v12 = vadd.f32 %v3158_v6, %v1545_v4 }
 0x395   :  { %v2099_v36 = vpop.f32.mrb[51].mxu0 }
 0x396   :  { %v1508_v15 = vadd.f32 %v2097_v8, %v3141_v44  ;;  %v2100_v16 = vadd.f32 %v2099_v36, %v2098_v10  ;;  %v1602_v17 = vmul.f32 %v3165_v13, %v1583_v11  ;;  %v1584_v18 = vmax.f32 %v3213_v12, 0.0 }
 0x398   :  { %v1546_v19 = vmul.f32 0.33333334, %v1508_v15  ;;  %v1511_v34 = vadd.f32 %v2100_v16, %v3145_v62  ;;  %1624 = vadd.xlane.f32.xlu1 %v1602_v17  ;;  %v1603_v40 = vmul.f32 %v3165_v13, %v1584_v18 }
 0x39a   :  { %v3225_v20 = vadd.f32 %v3158_v6, %v1546_v19  ;;  %v1547_v50 = vmul.f32 0.33333334, %v1511_v34  ;;  %v2101_v44 = vpop.f32.mrb[52].mxu0  ;;  %1626 = vadd.xlane.f32.xlu0 %v1603_v40 }
 0x39b   :  { %v2102_v21 = vpop.f32.mrb[53].mxu0 }
 0x39c   :  { %v3228_v22 = vadd.f32 %v3158_v6, %v1547_v50  ;;  %v2103_v23 = vadd.f32 %v2102_v21, %v2101_v44  ;;  %v2104_v25 = vpop.f32.mrb[54].mxu0  ;;  %v1585_v42 = vmax.f32 %v3225_v20, 0.0 }
 0x39d   :  { %v2105_v62 = vpop.f32.mrb[55].mxu0 }
 0x39e   :  { %v1516_v43 = vadd.f32 %v3139_v61, %v2103_v23  ;;  %v2106_v28 = vadd.f32 %v2105_v62, %v2104_v25  ;;  %v1604_v29 = vmul.f32 %v3165_v13, %v1585_v42  ;;  %v1586_v30 = vmax.f32 %v3228_v22, 0.0 }
 0x3a0   :  { %v1548_v32 = vmul.f32 0.33333334, %v1516_v43  ;;  %v1519_v33 = vadd.f32 %v3143_v37, %v2106_v28  ;;  %1628 = vadd.xlane.f32.xlu1 %v1604_v29  ;;  %v1605_v49 = vmul.f32 %v3165_v13, %v1586_v30 }
 0x3a2   :  { %v1549_v51 = vmul.f32 0.33333334, %v1519_v33  ;;  %v2107_v52 = vpop.f32.mrb[56].mxu0  ;;  %1630 = vadd.xlane.f32.xlu0 %v1605_v49  ;;  %v3241_v61 = vadd.f32 %v3158_v6, %v1548_v32 }
 0x3a3   :  { %v2108_v53 = vpop.f32.mrb[57].mxu0 }
 0x3a4   :  { %v2109_v55 = vadd.f32 %v2108_v53, %v2107_v52  ;;  %v2110_v56 = vpop.f32.mrb[58].mxu0  ;;  %v1587_v57 = vmax.f32 %v3241_v61, 0.0  ;;  %v3245_v59 = vadd.f32 %v3158_v6, %v1549_v51 }
 0x3a5   :  { %v2111_v37 = vpop.f32.mrb[59].mxu0 }
 0x3a6   :  { %v1524_v60 = vadd.f32 %v2109_v55, %v3149_v45  ;;  %v2112_v46 = vadd.f32 %v2111_v37, %v2110_v56  ;;  %v1606_v1 = vmul.f32 %v3165_v13, %v1587_v57  ;;  %v1588_v2 = vmax.f32 %v3245_v59, 0.0 }
 0x3a8   :  { %v1550_v3 = vmul.f32 0.33333334, %v1524_v60  ;;  %v1527_v4 = vadd.f32 %v2112_v46, %v3153_v0  ;;  %1632 = vadd.xlane.f32.xlu1 %v1606_v1  ;;  %v1607_v5 = vmul.f32 %v3165_v13, %v1588_v2 }
 0x3aa   :  { %v3257_v7 = vadd.f32 %v3158_v6, %v1550_v3  ;;  %v1551_v8 = vmul.f32 0.33333334, %v1527_v4  ;;  %v2113_v45 = vpop.f32.mrb[60].mxu0  ;;  %1634 = vadd.xlane.f32.xlu0 %v1607_v5 }
 0x3ab   :  { %v2114_v10 = vpop.f32.mrb[61].mxu0 }
 0x3ac   :  { %v3260_v36 = vadd.f32 %v3158_v6, %v1551_v8  ;;  %v2115_v15 = vadd.f32 %v2114_v10, %v2113_v45  ;;  %v2116_v16 = vpop.f32.mrb[62].mxu0  ;;  %v1589_v17 = vmax.f32 %v3257_v7, 0.0 }
 0x3ad   :  { %v2117_v0 = vpop.f32.mrb[63].mxu0 }
 0x3ae   :  { %v1532_v19 = vadd.f32 %v3147_v63, %v2115_v15  ;;  %v2118_v34 = vadd.f32 %v2117_v0, %v2116_v16  ;;  %v1608_v40 = vmul.f32 %v3165_v13, %v1589_v17  ;;  %v1590_v50 = vmax.f32 %v3260_v36, 0.0 }
 0x3b0   :  { %v1552_v44 = vmul.f32 0.33333334, %v1532_v19  ;;  %v1535_v21 = vadd.f32 %v3151_v39, %v2118_v34  ;;  %1636 = vadd.xlane.f32.xlu1 %v1608_v40  ;;  %v1609_v23 = vmul.f32 %v3165_v13, %v1590_v50 }
 0x3b2   :  { %v1553_v25 = vmul.f32 0.33333334, %v1535_v21  ;;  %1638 = vadd.xlane.f32.xlu0 %v1609_v23  ;;  %v3273_v62 = vadd.f32 %v3158_v6, %v1552_v44 }
 0x3b4   :  { %v1591_v63 = vmax.f32 %v3273_v62, 0.0  ;;  %v3277_v43 = vadd.f32 %v3158_v6, %v1553_v25 }
 0x3b6   :  { %v1610_v28 = vmul.f32 %v3165_v13, %v1591_v63  ;;  %v1592_v39 = vmax.f32 %v3277_v43, 0.0 }
 0x3b8   :  { %1640 = vadd.xlane.f32.xlu1 %v1610_v28  ;;  %v1611_v29 = vmul.f32 %v3165_v13, %v1592_v39 }
 0x3ba   :  { %1642 = vadd.xlane.f32.xlu0 %v1611_v29 }
 0x40d   :  { %v1613_v32 = vpop.xlane.xlu0 %1612 }
 0x40e   :  { %v1644_v33 = vmul.f32 0.03125, %v1613_v32 }
 0x40f   :  { %v1615_v49 = vpop.xlane.xlu1 %1614 }
 0x410   :  { %v1660_v51 = vsub.f32 %v1577_v38, %v1644_v33  ;;  %v1645_v6 = vmul.f32 0.03125, %v1615_v49 }
 0x412   :  { %v1661_v52 = vsub.f32 %v1578_v24, %v1645_v6  ;;  %v3291_v53 = vmul.f32 %v3165_v13, %v1660_v51 }
 0x414   :  { %v3294_v55 = vmul.f32 %v3165_v13, %v1661_v52  ;;  %v1692_v56 = vmul.f32 %v3291_v53, %v3291_v53 }
 0x415   :  { %v1617_v37 = vpop.xlane.xlu0 %1616 }
 0x416   :  { %v1646_v60 = vmul.f32 0.03125, %v1617_v37  ;;  %1708 = vadd.xlane.f32.xlu1 %v1692_v56  ;;  %v1693_v9 = vmul.f32 %v3294_v55, %v3294_v55 }
 0x418   :  { %v1662_v38 = vsub.f32 %v1579_v26, %v1646_v60  ;;  %1710 = vadd.xlane.f32.xlu0 %v1693_v9 }
 0x419   :  { %v1619_v14 = vpop.xlane.xlu0 %1618 }
 0x41a   :  { %v1647_v24 = vmul.f32 0.03125, %v1619_v14  ;;  %v3303_v46 = vmul.f32 %v3165_v13, %v1662_v38 }
 0x41c   :  { %v1663_v1 = vsub.f32 %v1580_v31, %v1647_v24  ;;  %v1694_v3 = vmul.f32 %v3303_v46, %v3303_v46 }
 0x41d   :  { %v1621_v4 = vpop.xlane.xlu1 %1620 }
 0x41e   :  { %v3310_v5 = vmul.f32 %v3165_v13, %v1663_v1  ;;  %v1648_v8 = vmul.f32 0.03125, %v1621_v4  ;;  %1712 = vadd.xlane.f32.xlu1 %v1694_v3 }
 0x41f   :  { %v1623_v41 = vpop.xlane.xlu0 %1622 }
 0x420   :  { %v1664_v26 = vsub.f32 %v1581_v35, %v1648_v8  ;;  %v1649_v45 = vmul.f32 0.03125, %v1623_v41  ;;  %v1695_v10 = vmul.f32 %v3310_v5, %v3310_v5 }
 0x422   :  { %v3317_v27 = vmul.f32 %v3165_v13, %v1664_v26  ;;  %v1665_v31 = vsub.f32 %v1582_v47, %v1649_v45  ;;  %1714 = vadd.xlane.f32.xlu0 %v1695_v10 }
 0x424   :  { %v3322_v15 = vmul.f32 %v3165_v13, %v1665_v31  ;;  %v1696_v16 = vmul.f32 %v3317_v27, %v3317_v27 }
 0x425   :  { %v1625_v0 = vpop.xlane.xlu1 %1624 }
 0x426   :  { %v1650_v48 = vmul.f32 0.03125, %v1625_v0  ;;  %1716 = vadd.xlane.f32.xlu1 %v1696_v16  ;;  %v1697_v35 = vmul.f32 %v3322_v15, %v3322_v15 }
 0x427   :  { %v1627_v19 = vpop.xlane.xlu0 %1626 }
 0x428   :  { %v1666_v34 = vsub.f32 %v1583_v11, %v1650_v48  ;;  %v1651_v40 = vmul.f32 0.03125, %v1627_v19  ;;  %1718 = vadd.xlane.f32.xlu0 %v1697_v35 }
 0x42a   :  { %v3331_v54 = vmul.f32 %v3165_v13, %v1666_v34  ;;  %v1667_v47 = vsub.f32 %v1584_v18, %v1651_v40  ;;  %v3401_v40 = vld [vmem:[%s3478_s10] ss:$0 sm:$0xff]  ;;  %s2425_s10 = smov [#allocation2]  }
 0x42c   :  { %v3336_v44 = vmul.f32 %v3165_v13, %v1667_v47  ;;  %v1698_v21 = vmul.f32 %v3331_v54, %v3331_v54 }
 0x42d   :  { %v1629_v23 = vpop.xlane.xlu1 %1628 }
 0x42e   :  { %v1652_v25 = vmul.f32 0.03125, %v1629_v23  ;;  %1720 = vadd.xlane.f32.xlu1 %v1698_v21  ;;  %v1699_v58 = vmul.f32 %v3336_v44, %v3336_v44 }
 0x42f   :  { %v1631_v11 = vpop.xlane.xlu0 %1630 }
 0x430   :  { %v1668_v28 = vsub.f32 %v1585_v42, %v1652_v25  ;;  %v1653_v29 = vmul.f32 0.03125, %v1631_v11  ;;  %1722 = vadd.xlane.f32.xlu0 %v1699_v58  ;;  %v3407_v58 = vld [vmem:[%s3479_s11] ss:$0 sm:$0xff]  ;;  %s1871_s11 = sshll.u32 %s2425_s10, 4  ;;  %s1872_s11 = int_to_ptr.vmem [resolvable:$true] %s1871_s11 }
 0x431   :  { %s2398_s19 = scalar_lea.vmem %s1872_s11, 2048  ;;  %p2403_p1 = scmp.lt.s32.totalorder %s1872_s11, %s1872_s11 }
 0x432   :  { %v3345_v12 = vmul.f32 %v3165_v13, %v1668_v28  ;;  %v1669_v18 = vsub.f32 %v1586_v30, %v1653_v29  ;;  %p2399_p0 = scmp.ne.s32.totalorder %s1872_s11, %s2398_s19  ;;  %p2404_p2 = scmp.lt.s32.totalorder %s2398_s19, %s2398_s19 }
 0x434   :  { %v3350_v32 = vmul.f32 %v3165_v13, %v1669_v18  ;;  %v1700_v33 = vmul.f32 %v3345_v12, %v3345_v12  ;;  %p2405_p3 = por %p2404_p2, %p2403_p1 }
 0x435   :  { %v1633_v49 = vpop.xlane.xlu1 %1632 }
 0x436   :  { %v1654_v51 = vmul.f32 0.03125, %v1633_v49  ;;  %1724 = vadd.xlane.f32.xlu1 %v1700_v33  ;;  %v1701_v20 = vmul.f32 %v3350_v32, %v3350_v32  ;;  %p2406_p4 = pnand %p2405_p3, %p2399_p0 }
 0x437   :  { %v1635_v42 = vpop.xlane.xlu0 %1634 }
 0x438   :  { %v1670_v6 = vsub.f32 %v1587_v57, %v1654_v51  ;;  %v1655_v52 = vmul.f32 0.03125, %v1635_v42  ;;  %1726 = vadd.xlane.f32.xlu0 %v1701_v20 }
 0x43a   :  { %v3359_v22 = vmul.f32 %v3165_v13, %v1670_v6  ;;  %v1671_v30 = vsub.f32 %v1588_v2, %v1655_v52 }
 0x43c   :  { %v3364_v56 = vmul.f32 %v3165_v13, %v1671_v30  ;;  %v1702_v37 = vmul.f32 %v3359_v22, %v3359_v22 }
 0x43d   :  { %v1637_v60 = vpop.xlane.xlu1 %1636 }
 0x43e   :  { %v1656_v9 = vmul.f32 0.03125, %v1637_v60  ;;  %1728 = vadd.xlane.f32.xlu1 %v1702_v37  ;;  %v1703_v61 = vmul.f32 %v3364_v56, %v3364_v56 }
 0x43f   :  { %v1639_v57 = vpop.xlane.xlu0 %1638 }
 0x440   :  { %v1672_v38 = vsub.f32 %v1589_v17, %v1656_v9  ;;  %v1657_v14 = vmul.f32 0.03125, %v1639_v57  ;;  %1730 = vadd.xlane.f32.xlu0 %v1703_v61 }
 0x442   :  { %v3373_v59 = vmul.f32 %v3165_v13, %v1672_v38  ;;  %v1673_v2 = vsub.f32 %v1590_v50, %v1657_v14 }
 0x444   :  { %v3378_v24 = vmul.f32 %v3165_v13, %v1673_v2  ;;  %v1704_v1 = vmul.f32 %v3373_v59, %v3373_v59 }
 0x445   :  { %v1641_v3 = vpop.xlane.xlu1 %1640 }
 0x446   :  { %v1658_v4 = vmul.f32 0.03125, %v1641_v3  ;;  %1732 = vadd.xlane.f32.xlu1 %v1704_v1  ;;  %v1705_v7 = vmul.f32 %v3378_v24, %v3378_v24 }
 0x447   :  { %v1643_v17 = vpop.xlane.xlu0 %1642 }
 0x448   :  { %v1674_v8 = vsub.f32 %v1591_v63, %v1658_v4  ;;  %v1659_v41 = vmul.f32 0.03125, %v1643_v17  ;;  %1734 = vadd.xlane.f32.xlu0 %v1705_v7 }
 0x44a   :  { %v3387_v36 = vmul.f32 %v3165_v13, %v1674_v8  ;;  %v1675_v50 = vsub.f32 %v1592_v39, %v1659_v41 }
 0x44c   :  { %v3392_v26 = vmul.f32 %v3165_v13, %v1675_v50  ;;  %v1706_v45 = vmul.f32 %v3387_v36, %v3387_v36 }
 0x44e   :  { %1736 = vadd.xlane.f32.xlu1 %v1706_v45  ;;  %v1707_v10 = vmul.f32 %v3392_v26, %v3392_v26 }
 0x450   :  { %1738 = vadd.xlane.f32.xlu0 %v1707_v10 }
 0x4a3   :  { %v1709_v62 = vpop.xlane.xlu1 %1708 }
 0x4a4   :  { %v1740_v63 = vmul.f32 0.03125, %v1709_v62 }
 0x4a5   :  { %v1711_v31 = vpop.xlane.xlu0 %1710 }
 0x4a6   :  { %v1756_v16 = vadd.f32 1e-05, %v1740_v63  ;;  %v1741_v0 = vmul.f32 0.03125, %v1711_v31 }
 0x4a8   :  { %2351 = vrsqrt.f32 %v1756_v16  ;;  %v1757_v48 = vadd.f32 1e-05, %v1741_v0 }
 0x4aa   :  { %2353 = vrsqrt.f32 %v1757_v48 }
 0x4ab   :  { %v1713_v43 = vpop.xlane.xlu1 %1712 }
 0x4ac   :  { %v1742_v39 = vmul.f32 0.03125, %v1713_v43 }
 0x4ae   :  { %v1758_v13 = vadd.f32 1e-05, %v1742_v39 }
 0x4af   :  { %v1715_v35 = vpop.xlane.xlu0 %1714 }
 0x4b0   :  { %2355 = vrsqrt.f32 %v1758_v13  ;;  %v1743_v19 = vmul.f32 0.03125, %v1715_v35 }
 0x4b2   :  { %v2352_v34 = vpop.eup %2351  ;;  %v1759_v47 = vadd.f32 1e-05, %v1743_v19 }
 0x4b3   :  { %v1788_v21 = vmul.f32 %v2352_v34, %v3291_v53  ;;  %v1717_v23 = vpop.xlane.xlu1 %1716 }
 0x4b4   :  { %v2354_v25 = vpop.eup %2353  ;;  %2357 = vrsqrt.f32 %v1759_v47  ;;  %v1744_v11 = vmul.f32 0.03125, %v1717_v23 }
 0x4b5   :  { %v1811_v28 = vmul.f32 %v3401_v40, %v1788_v21  ;;  %v1789_v29 = vmul.f32 %v2354_v25, %v3294_v55  ;;  %v1719_v18 = vpop.xlane.xlu0 %1718 }
 0x4b6   :  { %v1760_v33 = vadd.f32 1e-05, %v1744_v11  ;;  %v1745_v49 = vmul.f32 0.03125, %v1719_v18 }
 0x4b7   :  { %v1834_v51 = vadd.f32 %v3407_v58, %v1811_v28  ;;  %v1812_v53 = vmul.f32 %v3401_v40, %v1789_v29 }
 0x4b8   :  { %2359 = vrsqrt.f32 %v1760_v33  ;;  %v1761_v20 = vadd.f32 1e-05, %v1745_v49 }
 0x4b9   :  { %1850 = vst [vmem:[#allocation2] sm:$0xff] %v1834_v51  ;;  %v1835_v42 = vadd.f32 %v3407_v58, %v1812_v53 }
 0x4ba   :  { %v2356_v6 = vpop.eup %2355  ;;  %2361 = vrsqrt.f32 %v1761_v20 }
 0x4bb   :  { %1851 = vst [vmem:[#allocation2 + $0x8] sm:$0xff] %v1835_v42  ;;  %v1790_v52 = vmul.f32 %v2356_v6, %v3303_v46  ;;  %v1721_v30 = vpop.xlane.xlu1 %1720 }
 0x4bc   :  { %v1746_v37 = vmul.f32 0.03125, %v1721_v30 }
 0x4bd   :  { %v1813_v55 = vmul.f32 %v3401_v40, %v1790_v52  ;;  %v1723_v60 = vpop.xlane.xlu0 %1722 }
 0x4be   :  { %v2358_v9 = vpop.eup %2357  ;;  %v1762_v61 = vadd.f32 1e-05, %v1746_v37  ;;  %v1747_v57 = vmul.f32 0.03125, %v1723_v60 }
 0x4bf   :  { %v1836_v38 = vadd.f32 %v3407_v58, %v1813_v55  ;;  %v1791_v14 = vmul.f32 %v2358_v9, %v3310_v5 }
 0x4c0   :  { %2363 = vrsqrt.f32 %v1762_v61  ;;  %v1763_v2 = vadd.f32 1e-05, %v1747_v57 }
 0x4c1   :  { %1852 = vst [vmem:[#allocation2 + $0x10] sm:$0xff] %v1836_v38  ;;  %v1814_v1 = vmul.f32 %v3401_v40, %v1791_v14 }
 0x4c2   :  { %v2360_v3 = vpop.eup %2359  ;;  %2365 = vrsqrt.f32 %v1763_v2 }
 0x4c3   :  { %v1837_v46 = vadd.f32 %v3407_v58, %v1814_v1  ;;  %v1792_v4 = vmul.f32 %v2360_v3, %v3317_v27  ;;  %v1725_v7 = vpop.xlane.xlu1 %1724 }
 0x4c4   :  { %v2362_v17 = vpop.eup %2361  ;;  %v1748_v8 = vmul.f32 0.03125, %v1725_v7 }
 0x4c5   :  { %1853 = vst [vmem:[#allocation2 + $0x18] sm:$0xff] %v1837_v46  ;;  %v1815_v41 = vmul.f32 %v3401_v40, %v1792_v4  ;;  %v1793_v50 = vmul.f32 %v2362_v17, %v3322_v15  ;;  %v1727_v5 = vpop.xlane.xlu0 %1726 }
 0x4c6   :  { %v1764_v45 = vadd.f32 1e-05, %v1748_v8  ;;  %v1749_v10 = vmul.f32 0.03125, %v1727_v5 }
 0x4c7   :  { %v1838_v62 = vadd.f32 %v3407_v58, %v1815_v41  ;;  %v1816_v63 = vmul.f32 %v3401_v40, %v1793_v50 }
 0x4c8   :  { %2367 = vrsqrt.f32 %v1764_v45  ;;  %v1765_v31 = vadd.f32 1e-05, %v1749_v10 }
 0x4c9   :  { %1854 = vst [vmem:[#allocation2 + $0x20] sm:$0xff] %v1838_v62  ;;  %v1839_v27 = vadd.f32 %v3407_v58, %v1816_v63 }
 0x4ca   :  { %v2364_v16 = vpop.eup %2363  ;;  %2369 = vrsqrt.f32 %v1765_v31 }
 0x4cb   :  { %1855 = vst [vmem:[#allocation2 + $0x28] sm:$0xff] %v1839_v27  ;;  %v1794_v0 = vmul.f32 %v2364_v16, %v3331_v54  ;;  %v1729_v48 = vpop.xlane.xlu1 %1728 }
 0x4cc   :  { %v2366_v43 = vpop.eup %2365  ;;  %v1750_v15 = vmul.f32 0.03125, %v1729_v48 }
 0x4cd   :  { %v1817_v39 = vmul.f32 %v3401_v40, %v1794_v0  ;;  %v1795_v13 = vmul.f32 %v2366_v43, %v3336_v44  ;;  %v1731_v35 = vpop.xlane.xlu0 %1730 }
 0x4ce   :  { %v1766_v19 = vadd.f32 1e-05, %v1750_v15  ;;  %v1751_v34 = vmul.f32 0.03125, %v1731_v35 }
 0x4cf   :  { %v1840_v47 = vadd.f32 %v3407_v58, %v1817_v39  ;;  %v1818_v21 = vmul.f32 %v3401_v40, %v1795_v13 }
 0x4d0   :  { %2371 = vrsqrt.f32 %v1766_v19  ;;  %v1767_v23 = vadd.f32 1e-05, %v1751_v34 }
 0x4d1   :  { %1856 = vst [vmem:[#allocation2 + $0x30] sm:$0xff] %v1840_v47  ;;  %v1841_v25 = vadd.f32 %v3407_v58, %v1818_v21 }
 0x4d2   :  { %v2368_v54 = vpop.eup %2367  ;;  %2373 = vrsqrt.f32 %v1767_v23 }
 0x4d3   :  { %1857 = vst [vmem:[#allocation2 + $0x38] sm:$0xff] %v1841_v25  ;;  %v1796_v11 = vmul.f32 %v2368_v54, %v3345_v12  ;;  %v1733_v28 = vpop.xlane.xlu1 %1732 }
 0x4d4   :  { %v2370_v29 = vpop.eup %2369  ;;  %v1752_v44 = vmul.f32 0.03125, %v1733_v28 }
 0x4d5   :  { %v1819_v18 = vmul.f32 %v3401_v40, %v1796_v11  ;;  %v1797_v33 = vmul.f32 %v2370_v29, %v3350_v32  ;;  %v1735_v49 = vpop.xlane.xlu0 %1734 }
 0x4d6   :  { %v1768_v51 = vadd.f32 1e-05, %v1752_v44  ;;  %v1753_v53 = vmul.f32 0.03125, %v1735_v49 }
 0x4d7   :  { %v1842_v20 = vadd.f32 %v3407_v58, %v1819_v18  ;;  %v1820_v42 = vmul.f32 %v3401_v40, %v1797_v33 }
 0x4d8   :  { %2375 = vrsqrt.f32 %v1768_v51  ;;  %v1769_v6 = vadd.f32 1e-05, %v1753_v53 }
 0x4d9   :  { %1858 = vst [vmem:[#allocation2 + $0x40] sm:$0xff] %v1842_v20  ;;  %v1843_v52 = vadd.f32 %v3407_v58, %v1820_v42 }
 0x4da   :  { %v2372_v12 = vpop.eup %2371  ;;  %2377 = vrsqrt.f32 %v1769_v6 }
 0x4db   :  { %1859 = vst [vmem:[#allocation2 + $0x48] sm:$0xff] %v1843_v52  ;;  %v1798_v30 = vmul.f32 %v2372_v12, %v3359_v22  ;;  %v1737_v37 = vpop.xlane.xlu1 %1736 }
 0x4dc   :  { %v2374_v55 = vpop.eup %2373  ;;  %v1754_v32 = vmul.f32 0.03125, %v1737_v37 }
 0x4dd   :  { %v1821_v60 = vmul.f32 %v3401_v40, %v1798_v30  ;;  %v1799_v9 = vmul.f32 %v2374_v55, %v3364_v56  ;;  %v1739_v61 = vpop.xlane.xlu0 %1738 }
 0x4de   :  { %v1770_v57 = vadd.f32 1e-05, %v1754_v32  ;;  %v1755_v38 = vmul.f32 0.03125, %v1739_v61 }
 0x4df   :  { %v1844_v14 = vadd.f32 %v3407_v58, %v1821_v60  ;;  %v1822_v2 = vmul.f32 %v3401_v40, %v1799_v9 }
 0x4e0   :  { %2379 = vrsqrt.f32 %v1770_v57  ;;  %v1771_v1 = vadd.f32 1e-05, %v1755_v38 }
 0x4e1   :  { %1860 = vst [vmem:[#allocation2 + $0x50] sm:$0xff] %v1844_v14  ;;  %v1845_v3 = vadd.f32 %v3407_v58, %v1822_v2 }
 0x4e2   :  { %v2376_v22 = vpop.eup %2375  ;;  %2381 = vrsqrt.f32 %v1771_v1 }
 0x4e3   :  { %1861 = vst [vmem:[#allocation2 + $0x58] sm:$0xff] %v1845_v3  ;;  %v1800_v46 = vmul.f32 %v2376_v22, %v3373_v59 }
 0x4e4   :  { %v2378_v4 = vpop.eup %2377 }
 0x4e5   :  { %v1823_v56 = vmul.f32 %v3401_v40, %v1800_v46  ;;  %v1801_v7 = vmul.f32 %v2378_v4, %v3378_v24 }
 0x4e7   :  { %v1846_v17 = vadd.f32 %v3407_v58, %v1823_v56  ;;  %v1824_v8 = vmul.f32 %v3401_v40, %v1801_v7 }
 0x4e9   :  { %1862 = vst [vmem:[#allocation2 + $0x60] sm:$0xff] %v1846_v17  ;;  %v1847_v41 = vadd.f32 %v3407_v58, %v1824_v8 }
 0x4ea   :  { %v2380_v50 = vpop.eup %2379 }
 0x4eb   :  { %1863 = vst [vmem:[#allocation2 + $0x68] sm:$0xff] %v1847_v41  ;;  %v1802_v5 = vmul.f32 %v2380_v50, %v3387_v36 }
 0x4ec   :  { %v2382_v45 = vpop.eup %2381 }
 0x4ed   :  { %v1825_v10 = vmul.f32 %v3401_v40, %v1802_v5  ;;  %v1803_v59 = vmul.f32 %v2382_v45, %v3392_v26 }
 0x4ef   :  { %v1848_v24 = vadd.f32 %v3407_v58, %v1825_v10  ;;  %v1826_v62 = vmul.f32 %v3401_v40, %v1803_v59 }
 0x4f1   :  { %1864 = vst [vmem:[#allocation2 + $0x70] sm:$0xff] %v1848_v24  ;;  %v1849_v63 = vadd.f32 %v3407_v58, %v1826_v62 }
 0x4f3   :  { %1865 = vst [vmem:[#allocation2 + $0x78] sm:$0xff] %v1849_v63 }
 0x4f4   :  { %2409 = shalt.err (!%p2406_p4)
}
 0x4f5   :  { %s2410_s6 = scalar_lea.hbm %s3480_s12, 2048 }
 0x4f6   :  { %p2411_p5 = scmp.ne.s32.totalorder %s3480_s12, %s2410_s6  ;;  %p2414_p6 = scmp.lt.u32.totalorder %s2410_s6, %s3480_s12 }
 0x4f8   :  { %p2416_p7 = pnand %p2414_p6, %p2411_p5 }
 0x4fa   :  { %2419 = shalt.err (!%p2416_p7)
}
 0x4fb   :  { %s2426_s24 = smov 128   ;;  %s2427_s25 = smov 8  }
 0x4fc   :  { %1877 = dma.vmem_to_hbm [thread:$0]  %s1872_s11, 2048, %s3480_s12, [#allocation3], %s2426_s24, %s2426_s24, %s2427_s25  }
 0x4fd   :  { %2420 = dma.done.wait [#allocation3], 2048  }
 0x4fe   :  { %2421 = vsyncadd [#allocation3], 4294965248 }
 0x4ff   :  { %1881 = vsyncpa [#allocation3], 1 }

</bundles_post_ra>
